<compile_context>
chip_gen: v5e
topology: v5e:2x2
jax: 0.10.0
libtpu: 0.0.40
codegen_flags: <defaults>
</compile_context>

<pallas_src>
import functools

import jax
import jax.numpy as jnp
from jax.experimental import pallas as pl
from jax.experimental.pallas import tpu as pltpu

_VMEM_LIMIT = 32 * 1024 * 1024


# ----------------------------------------------------------------------------
# Pallas kernel 1: fused edge+corner prediction head, one grid step per image.
#   stem  : 3x3 conv (Cin -> 2C, PyTorch cross-correlation) + folded BN + ReLU
#   heads : edge 3x3 (C->1) and corner 1x1 (C->1) fused as one zero-embedded
#           3x3 conv (2C -> 2); the intermediate is zero-padded in a VMEM scratch.
#   out   : (1, 2, H*W) lane-dense NCHW-flat predictions (ch0 = edge, ch1 = corner)
# ----------------------------------------------------------------------------
def _make_head_kernel(H, W, Cin, C2):
    HW = H * W

    def kernel(xpad_ref, w1_ref, scale_ref, bias_ref, w2t_ref, o_ref, mid_ref):
        xpad = xpad_ref[0]                     # (H+2, W+2, Cin)
        w1 = w1_ref[...]                       # (9, Cin, C2)
        w2t = w2t_ref[...]                     # (9, 2, C2)

        # ---- fused stems: 9-tap accumulation (K = Cin is full MXU width at model size)
        acc1 = jnp.zeros((HW, C2), jnp.float32)
        for dy in range(3):
            for dx in range(3):
                col = xpad[dy:dy + H, dx:dx + W, :].reshape(HW, Cin)
                acc1 = acc1 + jnp.dot(col, w1[dy * 3 + dx],
                                      preferred_element_type=jnp.float32)
        mid = jnp.maximum(acc1 * scale_ref[...] + bias_ref[...], 0.0)   # (HW, C2)

        # ---- zero-pad intermediate in VMEM (second conv uses padding=1, zeros)
        mid_ref[...] = jnp.zeros_like(mid_ref)
        mid_ref[pl.ds(1, H), pl.ds(1, W), :] = mid.reshape(H, W, C2)

        # ---- fused heads: accumulate directly in transposed (2, HW) layout (lane dense)
        acc2 = jnp.zeros((2, HW), jnp.float32)
        for dy in range(3):
            for dx in range(3):
                col = mid_ref[pl.ds(dy, H), pl.ds(dx, W), :].reshape(HW, C2)
                acc2 = acc2 + jax.lax.dot_general(
                    w2t[dy * 3 + dx], col, (((1,), (1,)), ((), ())),
                    preferred_element_type=jnp.float32)
        o_ref[0] = acc2.astype(o_ref.dtype)

    return kernel


def pred_head_pallas(x_high_nchw, params):
    """x_high (N,C,Hh,Wh) -> predictions (N, 2, Hh*Wh); channel 0 = edge, 1 = corner."""
    N, C, H, W = x_high_nchw.shape
    C2 = 2 * C
    dt = x_high_nchw.dtype

    xh = jnp.transpose(x_high_nchw, (0, 2, 3, 1))                    # NHWC
    xpad = jnp.pad(xh, ((0, 0), (1, 1), (1, 1), (0, 0)))
    Hp, Wp = H + 2, W + 2

    # stems concatenated along Cout; BN folded into (scale, bias)
    w1 = jnp.concatenate([params["edge_w1"], params["corner_w1"]], axis=3)   # (3,3,C,2C)
    w1 = w1.reshape(9, C, C2).astype(dt)
    scale = jnp.concatenate([params["edge_scale"], params["corner_scale"]]).reshape(1, C2)
    bias = jnp.concatenate([params["edge_bias"], params["corner_bias"]]).reshape(1, C2)
    # heads fused: edge 3x3 over mid channels [0:C]; corner 1x1 embedded at centre tap [C:2C]
    w2 = jnp.zeros((3, 3, C2, 2), jnp.float32)
    w2 = w2.at[:, :, :C, 0].set(params["edge_w2"][:, :, :, 0])
    w2 = w2.at[1, 1, C:, 1].set(params["corner_w2"][0, 0, :, 0])
    w2t = jnp.transpose(w2, (0, 1, 3, 2)).reshape(9, 2, C2).astype(dt)

    kernel = _make_head_kernel(H, W, C, C2)
    return pl.pallas_call(
        kernel,
        out_shape=jax.ShapeDtypeStruct((N, 2, H * W), jnp.float32),
        grid=(N,),
        in_specs=[
            pl.BlockSpec((1, Hp, Wp, C), lambda n: (n, 0, 0, 0)),
            pl.BlockSpec((9, C, C2), lambda n: (0, 0, 0)),
            pl.BlockSpec((1, C2), lambda n: (0, 0)),
            pl.BlockSpec((1, C2), lambda n: (0, 0)),
            pl.BlockSpec((9, 2, C2), lambda n: (0, 0, 0)),
        ],
        out_specs=pl.BlockSpec((1, 2, H * W), lambda n: (n, 0, 0)),
        scratch_shapes=[pltpu.VMEM((Hp, Wp, C2), jnp.float32)],
        compiler_params=pltpu.CompilerParams(
            dimension_semantics=("parallel",),       # v7x: one image per TensorCore
            vmem_limit_bytes=_VMEM_LIMIT),
    )(xpad, w1, scale.astype(jnp.float32), bias.astype(jnp.float32), w2t)


# ----------------------------------------------------------------------------
# Pallas kernel 2: batched affinity = softmax(bmm) + fuse, point-major (N, P, C),
# P padded to a multiple of 128 lanes with masked softmax columns.
# ----------------------------------------------------------------------------
def _affinity_fuse_kernel(p_real, hi_ref, lo_ref, out_ref):
    hi = hi_ref[...].astype(jnp.float32)       # (N, Pp, C)
    lo = lo_ref[...].astype(jnp.float32)       # (N, Pp, C)
    # A[n,p,q] = sum_c lo[n,p,c] * hi[n,q,c]   (== torch bmm(hi^T, lo).transpose(2,1))
    a = jax.lax.dot_general(lo, hi, (((2,), (2,)), ((0,), (0,))),
                            preferred_element_type=jnp.float32)         # (N, Pp, Pp)
    q_idx = jax.lax.broadcasted_iota(jnp.int32, a.shape, 2)
    a = jnp.where(q_idx < p_real, a, -1e30)                             # mask padded cols
    a = a - jnp.max(a, axis=-1, keepdims=True)
    e = jnp.exp(a)
    s = e * pl.reciprocal(jnp.sum(e, axis=-1, keepdims=True), approx=True)
    # fused[n,p,c] = sum_q S[n,p,q] * hi[n,q,c] + lo[n,p,c]
    fused = jax.lax.dot_general(s, hi, (((2,), (1,)), ((0,), (0,))),
                                preferred_element_type=jnp.float32) + lo
    out_ref[...] = fused.astype(out_ref.dtype)


def affinity_fuse_pallas(hi_pc, lo_pc):
    """hi_pc, lo_pc: (N, P, C) point-major features -> fused (N, P, C)."""
    N, P, C = hi_pc.shape
    Pp = ((P + 127) // 128) * 128
    pad = ((0, 0), (0, Pp - P), (0, 0))
    out = pl.pallas_call(
        functools.partial(_affinity_fuse_kernel, P),
        out_shape=jax.ShapeDtypeStruct((N, Pp, C), jnp.float32),
        grid=(1,),
        in_specs=[pl.BlockSpec((N, Pp, C), lambda i: (0, 0, 0)),
                  pl.BlockSpec((N, Pp, C), lambda i: (0, 0, 0))],
        out_specs=pl.BlockSpec((N, Pp, C), lambda i: (0, 0, 0)),
        compiler_params=pltpu.CompilerParams(
            dimension_semantics=("arbitrary",),
            vmem_limit_bytes=_VMEM_LIMIT),
    )(jnp.pad(hi_pc, pad), jnp.pad(lo_pc, pad))
    return out[:, :P, :]


# ----------------------------------------------------------------------------
# JAX glue: top-k uncertain points + grid_sample(bilinear, align_corners=False,
# padding_mode='zeros') semantics. Gather kept in XLA.
# TODO(synk): fold the bilinear gather + affinity into one Pallas kernel with
# PrefetchScalarGridSpec (top-k indices in SMEM, x_high/x_low in pl.ANY) for large C/P.
# ----------------------------------------------------------------------------
def _to_point_major(feat_nchw):
    N, C, H, W = feat_nchw.shape
    return jnp.transpose(feat_nchw, (0, 2, 3, 1)).reshape(N, H * W, C)


def point_sample_bilinear(feat_pc, H, W, coords):
    """feat_pc (N, H*W, C); coords (N, P, 2) in [0,1]^2 -> (N, P, C)."""
    N, _, C = feat_pc.shape
    P = coords.shape[1]
    x = coords[..., 0] * W - 0.5
    y = coords[..., 1] * H - 0.5
    x0f = jnp.floor(x)
    y0f = jnp.floor(y)
    x0 = x0f.astype(jnp.int32)
    y0 = y0f.astype(jnp.int32)
    x1 = x0 + 1
    y1 = y0 + 1
    wx1 = x - x0f
    wx0 = 1.0 - wx1
    wy1 = y - y0f
    wy0 = 1.0 - wy1

    def gather(xi, yi):
        valid = ((xi >= 0) & (xi < W) & (yi >= 0) & (yi < H)).astype(feat_pc.dtype)
        xc = jnp.clip(xi, 0, W - 1)
        yc = jnp.clip(yi, 0, H - 1)
        idx = (yc * W + xc)[:, :, None]                                  # (N,P,1)
        g = jnp.take_along_axis(feat_pc, jnp.broadcast_to(idx, (N, P, C)), axis=1)
        return g * valid[:, :, None]

    return (gather(x0, y0) * (wx0 * wy0)[:, :, None]
            + gather(x1, y0) * (wx1 * wy0)[:, :, None]
            + gather(x0, y1) * (wx0 * wy1)[:, :, None]
            + gather(x1, y1) * (wx1 * wy1)[:, :, None])


# ----------------------------------------------------------------------------
# Module forward
# ----------------------------------------------------------------------------
def point_flow_forward(params, x_high, x_low, *, edge_points, corner_points):
    N, C, H, W = x_low.shape
    _, _, Hh, Wh = x_high.shape
    stride_ratio = float(H) / float(Hh)

    # fused edge+corner prediction head: one Pallas call -> (N, 2, Hh*Wh)
    preds = pred_head_pallas(x_high, params)
    edge_flat, corner_flat = preds[:, 0, :], preds[:, 1, :]
    edge_pred = edge_flat.reshape(N, 1, Hh, Wh)
    corner_pred = corner_flat.reshape(N, 1, Hh, Wh)

    xh_pc = _to_point_major(x_high)
    xl_pc = _to_point_major(x_low)

    def branch(pred_flat, num_points):
        k = min(Hh * Wh, int(num_points))
        _, idx = jax.lax.top_k(pred_flat, k)                             # (N, k)
        ix = (idx % Wh).astype(jnp.float32)
        iy = (idx // Wh).astype(jnp.float32)
        coords = jnp.stack([0.5 / Wh + ix / Wh, 0.5 / Hh + iy / Hh], axis=-1)
        low_idx = (ix * stride_ratio + iy * stride_ratio * W).astype(jnp.int32)
        hi_feat = point_sample_bilinear(xh_pc, Hh, Wh, coords)           # (N, k, C)
        lo_feat = point_sample_bilinear(xl_pc, H, W, coords)             # (N, k, C)
        fused = affinity_fuse_pallas(hi_feat, lo_feat)                   # (N, k, C)
        return low_idx, jnp.transpose(fused, (0, 2, 1))                  # (N, C, k)

    edge_idx, fusion_edge = branch(edge_flat, edge_points)
    corner_idx, fusion_corner = branch(corner_flat, corner_points)

    # scatter fused point features back into x_low (edge first, corner overwrites on overlap,
    # matching the PyTorch scatter order).
    flat = x_low.reshape(N, C, H * W)
    n_ix = jnp.arange(N)[:, None, None]
    c_ix = jnp.arange(C)[None, :, None]

    def scatter_dim2(buf, idx_np, src):
        idx_ncp = jnp.broadcast_to(idx_np[:, None, :], src.shape)
        return buf.at[n_ix, c_ix, idx_ncp].set(src)

    flat = scatter_dim2(flat, edge_idx, fusion_edge)
    flat = scatter_dim2(flat, corner_idx, fusion_corner)
    final_features = flat.reshape(N, C, H, W)

    # TODO(synk): gt_tag (GroundTrans) and gated channel-gate paths omitted
    # (instantiated with gt_tag=False, gated=False; GroundTrans source not provided).
    return final_features, edge_pred, corner_pred


# ----------------------------------------------------------------------------
# Deterministic parameter init (synthetic; no checkpoint load)
# ----------------------------------------------------------------------------
def init_params(key, in_planes):
    ks = jax.random.split(key, 4)
    eps = 1e-5

    def conv_w(k, kh, kw, cin, cout):
        bound = 1.0 / (cin * kh * kw) ** 0.5
        return jax.random.uniform(k, (kh, kw, cin, cout), jnp.float32, -bound, bound)

    # Norm2d(eval): gamma=1, beta=0, running_mean=0, running_var=1 -> folded affine
    gamma = jnp.ones((in_planes,), jnp.float32)
    beta = jnp.zeros((in_planes,), jnp.float32)
    mean = jnp.zeros((in_planes,), jnp.float32)
    var = jnp.ones((in_planes,), jnp.float32)
    scale = gamma / jnp.sqrt(var + eps)
    bias = beta - mean * scale
    return dict(
        edge_w1=conv_w(ks[0], 3, 3, in_planes, in_planes),
        edge_scale=scale, edge_bias=bias,
        edge_w2=conv_w(ks[1], 3, 3, in_planes, 1),
        corner_w1=conv_w(ks[2], 3, 3, in_planes, in_planes),
        corner_scale=scale, corner_bias=bias,
        corner_w2=conv_w(ks[3], 1, 1, in_planes, 1),
    )


if __name__ == "__main__":
    key = jax.random.PRNGKey(0)
    k_hi, k_lo, k_par = jax.random.split(key, 3)

    in_planes = 8
    edge_points = 8
    corner_points = 8
    x_high = jax.random.normal(k_hi, (2, in_planes, 8, 8), jnp.float32)
    x_low = jax.random.normal(k_lo, (2, in_planes, 16, 16), jnp.float32)
    params = init_params(k_par, in_planes)

    fwd = jax.jit(functools.partial(point_flow_forward,
                                    edge_points=edge_points,
                                    corner_points=corner_points))
    final, edge_pred, corner_pred = jax.block_until_ready(fwd(params, x_high, x_low))

    assert final.shape == (2, in_planes, 16, 16)
    assert edge_pred.shape == (2, 1, 8, 8)
    assert corner_pred.shape == (2, 1, 8, 8)

    # --- check 1: fused prediction head vs. lax.conv reference of the torch Sequentials ---
    dn = ("NHWC", "HWIO", "NHWC")
    xh_nhwc = jnp.transpose(x_high, (0, 2, 3, 1))

    def conv(x, w, pad):
        return jax.lax.conv_general_dilated(
            x, w, (1, 1), [(pad, pad), (pad, pad)], dimension_numbers=dn)

    stem_e = jnp.maximum(conv(xh_nhwc, params["edge_w1"], 1) * params["edge_scale"]
                         + params["edge_bias"], 0.0)
    edge_ref = jnp.transpose(conv(stem_e, params["edge_w2"], 1), (0, 3, 1, 2))
    stem_c = jnp.maximum(conv(xh_nhwc, params["corner_w1"], 1) * params["corner_scale"]
                         + params["corner_bias"], 0.0)
    corner_ref = jnp.transpose(conv(stem_c, params["corner_w2"], 0), (0, 3, 1, 2))
    assert jnp.allclose(edge_pred, edge_ref, atol=1e-3, rtol=1e-3)
    assert jnp.allclose(corner_pred, corner_ref, atol=1e-3, rtol=1e-3)

    # --- check 2: batched/padded affinity kernel vs. pure-JAX torch bmm/softmax reference ---
    hi = jax.random.normal(jax.random.PRNGKey(7), (2, edge_points, in_planes), jnp.float32)
    lo = jax.random.normal(jax.random.PRNGKey(11), (2, edge_points, in_planes), jnp.float32)
    a_ref = jnp.einsum("npc,nqc->npq", lo, hi)
    s_ref = jax.nn.softmax(a_ref, axis=-1)
    fused_ref = jnp.einsum("npq,nqc->npc", s_ref, hi) + lo
    fused_pal = affinity_fuse_pallas(hi, lo)
    assert jnp.max(jnp.abs(fused_pal - fused_ref)) < 5e-2   # approx reciprocal in softmax

    print("KERNEL_OK")
</pallas_src>

<mosaic_0001>
module attributes {stable_mosaic.version = 11 : i64} {
  func.func @kernel(%arg0: i32, %arg1: memref<1x10x10x8xf32, #tpu.memory_space<vmem>>, %arg2: memref<9x8x16xf32, #tpu.memory_space<vmem>>, %arg3: memref<1x16xf32, #tpu.memory_space<vmem>>, %arg4: memref<1x16xf32, #tpu.memory_space<vmem>>, %arg5: memref<9x2x16xf32, #tpu.memory_space<vmem>>, %arg6: memref<1x2x64xf32, #tpu.memory_space<vmem>>, %arg7: memref<10x10x16xf32, #tpu.memory_space<vmem>>) attributes {dimension_semantics = [#tpu.dimension_semantics<parallel>], iteration_bounds = array<i64: 2>, scalar_prefetch = 0 : i64, scratch_operands = 1 : i64, tpu.core_type = #tpu.core_type<tc>, window_params = [{transform_indices = @transform_0, window_bounds = array<i64: 1, 10, 10, 8>}, {pipeline_mode = #tpu.pipeline_mode<synchronous>, transform_indices = @transform_1, window_bounds = array<i64: 9, 8, 16>}, {pipeline_mode = #tpu.pipeline_mode<synchronous>, transform_indices = @transform_2, window_bounds = array<i64: 1, 16>}, {pipeline_mode = #tpu.pipeline_mode<synchronous>, transform_indices = @transform_3, window_bounds = array<i64: 1, 16>}, {pipeline_mode = #tpu.pipeline_mode<synchronous>, transform_indices = @transform_4, window_bounds = array<i64: 9, 2, 16>}, {transform_indices = @transform_5, window_bounds = array<i64: 1, 2, 64>}]} {
    %c0 = arith.constant 0 : index
    %c0_0 = arith.constant 0 : index
    %c0_1 = arith.constant 0 : index
    %c0_2 = arith.constant 0 : index
    %0 = vector.load %arg1[%c0, %c0_0, %c0_1, %c0_2] : memref<1x10x10x8xf32, #tpu.memory_space<vmem>>, vector<1x10x10x8xf32>
    %1 = vector.shape_cast %0 : vector<1x10x10x8xf32> to vector<10x10x8xf32>
    %c0_3 = arith.constant 0 : index
    %c0_4 = arith.constant 0 : index
    %c0_5 = arith.constant 0 : index
    %2 = vector.load %arg2[%c0_3, %c0_4, %c0_5] : memref<9x8x16xf32, #tpu.memory_space<vmem>>, vector<9x8x16xf32>
    %c0_6 = arith.constant 0 : index
    %c0_7 = arith.constant 0 : index
    %c0_8 = arith.constant 0 : index
    %3 = vector.load %arg5[%c0_6, %c0_7, %c0_8] : memref<9x2x16xf32, #tpu.memory_space<vmem>>, vector<9x2x16xf32>
    %cst = arith.constant 0.000000e+00 : f32
    %4 = vector.broadcast %cst : f32 to vector<64x16xf32>
    %5 = vector.extract_strided_slice %1 {offsets = [0, 0, 0], sizes = [8, 8, 8], strides = [1, 1, 1]} : vector<10x10x8xf32> to vector<8x8x8xf32>
    %6 = vector.shape_cast %5 : vector<8x8x8xf32> to vector<64x8xf32>
    %7 = vector.extract_strided_slice %2 {offsets = [0, 0, 0], sizes = [1, 8, 16], strides = [1, 1, 1]} : vector<9x8x16xf32> to vector<1x8x16xf32>
    %8 = vector.shape_cast %7 : vector<1x8x16xf32> to vector<8x16xf32>
    %cst_9 = arith.constant dense<0.000000e+00> : vector<64x16xf32>
    %9 = tpu.matmul %6, %8, %cst_9 {dimension_numbers = #tpu.dot_dimension_numbers<[1], [0], [0], [1], [0, 0, 1, 1], [], []>} : vector<64x8xf32>, vector<8x16xf32>, vector<64x16xf32> -> vector<64x16xf32>
    %10 = arith.addf %4, %9 : vector<64x16xf32>
    %11 = vector.extract_strided_slice %1 {offsets = [0, 1, 0], sizes = [8, 8, 8], strides = [1, 1, 1]} : vector<10x10x8xf32> to vector<8x8x8xf32>
    %12 = vector.shape_cast %11 : vector<8x8x8xf32> to vector<64x8xf32>
    %13 = vector.extract_strided_slice %2 {offsets = [1, 0, 0], sizes = [1, 8, 16], strides = [1, 1, 1]} : vector<9x8x16xf32> to vector<1x8x16xf32>
    %14 = vector.shape_cast %13 : vector<1x8x16xf32> to vector<8x16xf32>
    %cst_10 = arith.constant dense<0.000000e+00> : vector<64x16xf32>
    %15 = tpu.matmul %12, %14, %cst_10 {dimension_numbers = #tpu.dot_dimension_numbers<[1], [0], [0], [1], [0, 0, 1, 1], [], []>} : vector<64x8xf32>, vector<8x16xf32>, vector<64x16xf32> -> vector<64x16xf32>
    %16 = arith.addf %10, %15 : vector<64x16xf32>
    %17 = vector.extract_strided_slice %1 {offsets = [0, 2, 0], sizes = [8, 8, 8], strides = [1, 1, 1]} : vector<10x10x8xf32> to vector<8x8x8xf32>
    %18 = vector.shape_cast %17 : vector<8x8x8xf32> to vector<64x8xf32>
    %19 = vector.extract_strided_slice %2 {offsets = [2, 0, 0], sizes = [1, 8, 16], strides = [1, 1, 1]} : vector<9x8x16xf32> to vector<1x8x16xf32>
    %20 = vector.shape_cast %19 : vector<1x8x16xf32> to vector<8x16xf32>
    %cst_11 = arith.constant dense<0.000000e+00> : vector<64x16xf32>
    %21 = tpu.matmul %18, %20, %cst_11 {dimension_numbers = #tpu.dot_dimension_numbers<[1], [0], [0], [1], [0, 0, 1, 1], [], []>} : vector<64x8xf32>, vector<8x16xf32>, vector<64x16xf32> -> vector<64x16xf32>
    %22 = arith.addf %16, %21 : vector<64x16xf32>
    %23 = vector.extract_strided_slice %1 {offsets = [1, 0, 0], sizes = [8, 8, 8], strides = [1, 1, 1]} : vector<10x10x8xf32> to vector<8x8x8xf32>
    %24 = vector.shape_cast %23 : vector<8x8x8xf32> to vector<64x8xf32>
    %25 = vector.extract_strided_slice %2 {offsets = [3, 0, 0], sizes = [1, 8, 16], strides = [1, 1, 1]} : vector<9x8x16xf32> to vector<1x8x16xf32>
    %26 = vector.shape_cast %25 : vector<1x8x16xf32> to vector<8x16xf32>
    %cst_12 = arith.constant dense<0.000000e+00> : vector<64x16xf32>
    %27 = tpu.matmul %24, %26, %cst_12 {dimension_numbers = #tpu.dot_dimension_numbers<[1], [0], [0], [1], [0, 0, 1, 1], [], []>} : vector<64x8xf32>, vector<8x16xf32>, vector<64x16xf32> -> vector<64x16xf32>
    %28 = arith.addf %22, %27 : vector<64x16xf32>
    %29 = vector.extract_strided_slice %1 {offsets = [1, 1, 0], sizes = [8, 8, 8], strides = [1, 1, 1]} : vector<10x10x8xf32> to vector<8x8x8xf32>
    %30 = vector.shape_cast %29 : vector<8x8x8xf32> to vector<64x8xf32>
    %31 = vector.extract_strided_slice %2 {offsets = [4, 0, 0], sizes = [1, 8, 16], strides = [1, 1, 1]} : vector<9x8x16xf32> to vector<1x8x16xf32>
    %32 = vector.shape_cast %31 : vector<1x8x16xf32> to vector<8x16xf32>
    %cst_13 = arith.constant dense<0.000000e+00> : vector<64x16xf32>
    %33 = tpu.matmul %30, %32, %cst_13 {dimension_numbers = #tpu.dot_dimension_numbers<[1], [0], [0], [1], [0, 0, 1, 1], [], []>} : vector<64x8xf32>, vector<8x16xf32>, vector<64x16xf32> -> vector<64x16xf32>
    %34 = arith.addf %28, %33 : vector<64x16xf32>
    %35 = vector.extract_strided_slice %1 {offsets = [1, 2, 0], sizes = [8, 8, 8], strides = [1, 1, 1]} : vector<10x10x8xf32> to vector<8x8x8xf32>
    %36 = vector.shape_cast %35 : vector<8x8x8xf32> to vector<64x8xf32>
    %37 = vector.extract_strided_slice %2 {offsets = [5, 0, 0], sizes = [1, 8, 16], strides = [1, 1, 1]} : vector<9x8x16xf32> to vector<1x8x16xf32>
    %38 = vector.shape_cast %37 : vector<1x8x16xf32> to vector<8x16xf32>
    %cst_14 = arith.constant dense<0.000000e+00> : vector<64x16xf32>
    %39 = tpu.matmul %36, %38, %cst_14 {dimension_numbers = #tpu.dot_dimension_numbers<[1], [0], [0], [1], [0, 0, 1, 1], [], []>} : vector<64x8xf32>, vector<8x16xf32>, vector<64x16xf32> -> vector<64x16xf32>
    %40 = arith.addf %34, %39 : vector<64x16xf32>
    %41 = vector.extract_strided_slice %1 {offsets = [2, 0, 0], sizes = [8, 8, 8], strides = [1, 1, 1]} : vector<10x10x8xf32> to vector<8x8x8xf32>
    %42 = vector.shape_cast %41 : vector<8x8x8xf32> to vector<64x8xf32>
    %43 = vector.extract_strided_slice %2 {offsets = [6, 0, 0], sizes = [1, 8, 16], strides = [1, 1, 1]} : vector<9x8x16xf32> to vector<1x8x16xf32>
    %44 = vector.shape_cast %43 : vector<1x8x16xf32> to vector<8x16xf32>
    %cst_15 = arith.constant dense<0.000000e+00> : vector<64x16xf32>
    %45 = tpu.matmul %42, %44, %cst_15 {dimension_numbers = #tpu.dot_dimension_numbers<[1], [0], [0], [1], [0, 0, 1, 1], [], []>} : vector<64x8xf32>, vector<8x16xf32>, vector<64x16xf32> -> vector<64x16xf32>
    %46 = arith.addf %40, %45 : vector<64x16xf32>
    %47 = vector.extract_strided_slice %1 {offsets = [2, 1, 0], sizes = [8, 8, 8], strides = [1, 1, 1]} : vector<10x10x8xf32> to vector<8x8x8xf32>
    %48 = vector.shape_cast %47 : vector<8x8x8xf32> to vector<64x8xf32>
    %49 = vector.extract_strided_slice %2 {offsets = [7, 0, 0], sizes = [1, 8, 16], strides = [1, 1, 1]} : vector<9x8x16xf32> to vector<1x8x16xf32>
    %50 = vector.shape_cast %49 : vector<1x8x16xf32> to vector<8x16xf32>
    %cst_16 = arith.constant dense<0.000000e+00> : vector<64x16xf32>
    %51 = tpu.matmul %48, %50, %cst_16 {dimension_numbers = #tpu.dot_dimension_numbers<[1], [0], [0], [1], [0, 0, 1, 1], [], []>} : vector<64x8xf32>, vector<8x16xf32>, vector<64x16xf32> -> vector<64x16xf32>
    %52 = arith.addf %46, %51 : vector<64x16xf32>
    %53 = vector.extract_strided_slice %1 {offsets = [2, 2, 0], sizes = [8, 8, 8], strides = [1, 1, 1]} : vector<10x10x8xf32> to vector<8x8x8xf32>
    %54 = vector.shape_cast %53 : vector<8x8x8xf32> to vector<64x8xf32>
    %55 = vector.extract_strided_slice %2 {offsets = [8, 0, 0], sizes = [1, 8, 16], strides = [1, 1, 1]} : vector<9x8x16xf32> to vector<1x8x16xf32>
    %56 = vector.shape_cast %55 : vector<1x8x16xf32> to vector<8x16xf32>
    %cst_17 = arith.constant dense<0.000000e+00> : vector<64x16xf32>
    %57 = tpu.matmul %54, %56, %cst_17 {dimension_numbers = #tpu.dot_dimension_numbers<[1], [0], [0], [1], [0, 0, 1, 1], [], []>} : vector<64x8xf32>, vector<8x16xf32>, vector<64x16xf32> -> vector<64x16xf32>
    %58 = arith.addf %52, %57 : vector<64x16xf32>
    %c0_18 = arith.constant 0 : index
    %c0_19 = arith.constant 0 : index
    %59 = vector.load %arg3[%c0_18, %c0_19] : memref<1x16xf32, #tpu.memory_space<vmem>>, vector<1x16xf32>
    %60 = vector.broadcast %59 : vector<1x16xf32> to vector<64x16xf32>
    %61 = arith.mulf %58, %60 : vector<64x16xf32>
    %c0_20 = arith.constant 0 : index
    %c0_21 = arith.constant 0 : index
    %62 = vector.load %arg4[%c0_20, %c0_21] : memref<1x16xf32, #tpu.memory_space<vmem>>, vector<1x16xf32>
    %63 = vector.broadcast %62 : vector<1x16xf32> to vector<64x16xf32>
    %64 = arith.addf %61, %63 : vector<64x16xf32>
    %cst_22 = arith.constant 0.000000e+00 : f32
    %65 = vector.broadcast %cst_22 : f32 to vector<64x16xf32>
    %66 = arith.maximumf %64, %65 : vector<64x16xf32>
    %cst_23 = arith.constant 0.000000e+00 : f32
    %67 = vector.broadcast %cst_23 : f32 to vector<10x10x16xf32>
    %c0_24 = arith.constant 0 : index
    %c0_25 = arith.constant 0 : index
    %c0_26 = arith.constant 0 : index
    %68 = vector.load %arg7[%c0_24, %c0_25, %c0_26] : memref<10x10x16xf32, #tpu.memory_space<vmem>>, vector<10x10x16xf32>
    tpu.vector_store %arg7[%c0_24, %c0_25, %c0_26], %67 {strides = array<i32>} : memref<10x10x16xf32, #tpu.memory_space<vmem>>, vector<10x10x16xf32>,
    %69 = vector.shape_cast %66 : vector<64x16xf32> to vector<8x8x16xf32>
    %c1 = arith.constant 1 : index
    %c1_27 = arith.constant 1 : index
    %c0_28 = arith.constant 0 : index
    %70 = vector.load %arg7[%c1, %c1_27, %c0_28] : memref<10x10x16xf32, #tpu.memory_space<vmem>>, vector<8x8x16xf32>
    tpu.vector_store %arg7[%c1, %c1_27, %c0_28], %69 {strides = array<i32>} : memref<10x10x16xf32, #tpu.memory_space<vmem>>, vector<8x8x16xf32>,
    %cst_29 = arith.constant 0.000000e+00 : f32
    %71 = vector.broadcast %cst_29 : f32 to vector<2x64xf32>
    %c0_30 = arith.constant 0 : index
    %c0_31 = arith.constant 0 : index
    %c0_32 = arith.constant 0 : index
    %72 = vector.load %arg7[%c0_30, %c0_31, %c0_32] : memref<10x10x16xf32, #tpu.memory_space<vmem>>, vector<8x8x16xf32>
    %73 = vector.shape_cast %72 : vector<8x8x16xf32> to vector<64x16xf32>
    %74 = vector.extract_strided_slice %3 {offsets = [0, 0, 0], sizes = [1, 2, 16], strides = [1, 1, 1]} : vector<9x2x16xf32> to vector<1x2x16xf32>
    %75 = vector.shape_cast %74 : vector<1x2x16xf32> to vector<2x16xf32>
    %cst_33 = arith.constant dense<0.000000e+00> : vector<2x64xf32>
    %76 = tpu.matmul %75, %73, %cst_33 {dimension_numbers = #tpu.dot_dimension_numbers<[1], [1], [0], [0], [0, 0, 1, 0], [], []>} : vector<2x16xf32>, vector<64x16xf32>, vector<2x64xf32> -> vector<2x64xf32>
    %77 = arith.addf %71, %76 : vector<2x64xf32>
    %c0_34 = arith.constant 0 : index
    %c1_35 = arith.constant 1 : index
    %c0_36 = arith.constant 0 : index
    %78 = vector.load %arg7[%c0_34, %c1_35, %c0_36] : memref<10x10x16xf32, #tpu.memory_space<vmem>>, vector<8x8x16xf32>
    %79 = vector.shape_cast %78 : vector<8x8x16xf32> to vector<64x16xf32>
    %80 = vector.extract_strided_slice %3 {offsets = [1, 0, 0], sizes = [1, 2, 16], strides = [1, 1, 1]} : vector<9x2x16xf32> to vector<1x2x16xf32>
    %81 = vector.shape_cast %80 : vector<1x2x16xf32> to vector<2x16xf32>
    %cst_37 = arith.constant dense<0.000000e+00> : vector<2x64xf32>
    %82 = tpu.matmul %81, %79, %cst_37 {dimension_numbers = #tpu.dot_dimension_numbers<[1], [1], [0], [0], [0, 0, 1, 0], [], []>} : vector<2x16xf32>, vector<64x16xf32>, vector<2x64xf32> -> vector<2x64xf32>
    %83 = arith.addf %77, %82 : vector<2x64xf32>
    %c0_38 = arith.constant 0 : index
    %c2 = arith.constant 2 : index
    %c0_39 = arith.constant 0 : index
    %84 = vector.load %arg7[%c0_38, %c2, %c0_39] : memref<10x10x16xf32, #tpu.memory_space<vmem>>, vector<8x8x16xf32>
    %85 = vector.shape_cast %84 : vector<8x8x16xf32> to vector<64x16xf32>
    %86 = vector.extract_strided_slice %3 {offsets = [2, 0, 0], sizes = [1, 2, 16], strides = [1, 1, 1]} : vector<9x2x16xf32> to vector<1x2x16xf32>
    %87 = vector.shape_cast %86 : vector<1x2x16xf32> to vector<2x16xf32>
    %cst_40 = arith.constant dense<0.000000e+00> : vector<2x64xf32>
    %88 = tpu.matmul %87, %85, %cst_40 {dimension_numbers = #tpu.dot_dimension_numbers<[1], [1], [0], [0], [0, 0, 1, 0], [], []>} : vector<2x16xf32>, vector<64x16xf32>, vector<2x64xf32> -> vector<2x64xf32>
    %89 = arith.addf %83, %88 : vector<2x64xf32>
    %c1_41 = arith.constant 1 : index
    %c0_42 = arith.constant 0 : index
    %c0_43 = arith.constant 0 : index
    %90 = vector.load %arg7[%c1_41, %c0_42, %c0_43] : memref<10x10x16xf32, #tpu.memory_space<vmem>>, vector<8x8x16xf32>
    %91 = vector.shape_cast %90 : vector<8x8x16xf32> to vector<64x16xf32>
    %92 = vector.extract_strided_slice %3 {offsets = [3, 0, 0], sizes = [1, 2, 16], strides = [1, 1, 1]} : vector<9x2x16xf32> to vector<1x2x16xf32>
    %93 = vector.shape_cast %92 : vector<1x2x16xf32> to vector<2x16xf32>
    %cst_44 = arith.constant dense<0.000000e+00> : vector<2x64xf32>
    %94 = tpu.matmul %93, %91, %cst_44 {dimension_numbers = #tpu.dot_dimension_numbers<[1], [1], [0], [0], [0, 0, 1, 0], [], []>} : vector<2x16xf32>, vector<64x16xf32>, vector<2x64xf32> -> vector<2x64xf32>
    %95 = arith.addf %89, %94 : vector<2x64xf32>
    %c1_45 = arith.constant 1 : index
    %c1_46 = arith.constant 1 : index
    %c0_47 = arith.constant 0 : index
    %96 = vector.load %arg7[%c1_45, %c1_46, %c0_47] : memref<10x10x16xf32, #tpu.memory_space<vmem>>, vector<8x8x16xf32>
    %97 = vector.shape_cast %96 : vector<8x8x16xf32> to vector<64x16xf32>
    %98 = vector.extract_strided_slice %3 {offsets = [4, 0, 0], sizes = [1, 2, 16], strides = [1, 1, 1]} : vector<9x2x16xf32> to vector<1x2x16xf32>
    %99 = vector.shape_cast %98 : vector<1x2x16xf32> to vector<2x16xf32>
    %cst_48 = arith.constant dense<0.000000e+00> : vector<2x64xf32>
    %100 = tpu.matmul %99, %97, %cst_48 {dimension_numbers = #tpu.dot_dimension_numbers<[1], [1], [0], [0], [0, 0, 1, 0], [], []>} : vector<2x16xf32>, vector<64x16xf32>, vector<2x64xf32> -> vector<2x64xf32>
    %101 = arith.addf %95, %100 : vector<2x64xf32>
    %c1_49 = arith.constant 1 : index
    %c2_50 = arith.constant 2 : index
    %c0_51 = arith.constant 0 : index
    %102 = vector.load %arg7[%c1_49, %c2_50, %c0_51] : memref<10x10x16xf32, #tpu.memory_space<vmem>>, vector<8x8x16xf32>
    %103 = vector.shape_cast %102 : vector<8x8x16xf32> to vector<64x16xf32>
    %104 = vector.extract_strided_slice %3 {offsets = [5, 0, 0], sizes = [1, 2, 16], strides = [1, 1, 1]} : vector<9x2x16xf32> to vector<1x2x16xf32>
    %105 = vector.shape_cast %104 : vector<1x2x16xf32> to vector<2x16xf32>
    %cst_52 = arith.constant dense<0.000000e+00> : vector<2x64xf32>
    %106 = tpu.matmul %105, %103, %cst_52 {dimension_numbers = #tpu.dot_dimension_numbers<[1], [1], [0], [0], [0, 0, 1, 0], [], []>} : vector<2x16xf32>, vector<64x16xf32>, vector<2x64xf32> -> vector<2x64xf32>
    %107 = arith.addf %101, %106 : vector<2x64xf32>
    %c2_53 = arith.constant 2 : index
    %c0_54 = arith.constant 0 : index
    %c0_55 = arith.constant 0 : index
    %108 = vector.load %arg7[%c2_53, %c0_54, %c0_55] : memref<10x10x16xf32, #tpu.memory_space<vmem>>, vector<8x8x16xf32>
    %109 = vector.shape_cast %108 : vector<8x8x16xf32> to vector<64x16xf32>
    %110 = vector.extract_strided_slice %3 {offsets = [6, 0, 0], sizes = [1, 2, 16], strides = [1, 1, 1]} : vector<9x2x16xf32> to vector<1x2x16xf32>
    %111 = vector.shape_cast %110 : vector<1x2x16xf32> to vector<2x16xf32>
    %cst_56 = arith.constant dense<0.000000e+00> : vector<2x64xf32>
    %112 = tpu.matmul %111, %109, %cst_56 {dimension_numbers = #tpu.dot_dimension_numbers<[1], [1], [0], [0], [0, 0, 1, 0], [], []>} : vector<2x16xf32>, vector<64x16xf32>, vector<2x64xf32> -> vector<2x64xf32>
    %113 = arith.addf %107, %112 : vector<2x64xf32>
    %c2_57 = arith.constant 2 : index
    %c1_58 = arith.constant 1 : index
    %c0_59 = arith.constant 0 : index
    %114 = vector.load %arg7[%c2_57, %c1_58, %c0_59] : memref<10x10x16xf32, #tpu.memory_space<vmem>>, vector<8x8x16xf32>
    %115 = vector.shape_cast %114 : vector<8x8x16xf32> to vector<64x16xf32>
    %116 = vector.extract_strided_slice %3 {offsets = [7, 0, 0], sizes = [1, 2, 16], strides = [1, 1, 1]} : vector<9x2x16xf32> to vector<1x2x16xf32>
    %117 = vector.shape_cast %116 : vector<1x2x16xf32> to vector<2x16xf32>
    %cst_60 = arith.constant dense<0.000000e+00> : vector<2x64xf32>
    %118 = tpu.matmul %117, %115, %cst_60 {dimension_numbers = #tpu.dot_dimension_numbers<[1], [1], [0], [0], [0, 0, 1, 0], [], []>} : vector<2x16xf32>, vector<64x16xf32>, vector<2x64xf32> -> vector<2x64xf32>
    %119 = arith.addf %113, %118 : vector<2x64xf32>
    %c2_61 = arith.constant 2 : index
    %c2_62 = arith.constant 2 : index
    %c0_63 = arith.constant 0 : index
    %120 = vector.load %arg7[%c2_61, %c2_62, %c0_63] : memref<10x10x16xf32, #tpu.memory_space<vmem>>, vector<8x8x16xf32>
    %121 = vector.shape_cast %120 : vector<8x8x16xf32> to vector<64x16xf32>
    %122 = vector.extract_strided_slice %3 {offsets = [8, 0, 0], sizes = [1, 2, 16], strides = [1, 1, 1]} : vector<9x2x16xf32> to vector<1x2x16xf32>
    %123 = vector.shape_cast %122 : vector<1x2x16xf32> to vector<2x16xf32>
    %cst_64 = arith.constant dense<0.000000e+00> : vector<2x64xf32>
    %124 = tpu.matmul %123, %121, %cst_64 {dimension_numbers = #tpu.dot_dimension_numbers<[1], [1], [0], [0], [0, 0, 1, 0], [], []>} : vector<2x16xf32>, vector<64x16xf32>, vector<2x64xf32> -> vector<2x64xf32>
    %125 = arith.addf %119, %124 : vector<2x64xf32>
    %c0_65 = arith.constant 0 : index
    %c0_66 = arith.constant 0 : index
    %c0_67 = arith.constant 0 : index
    %126 = vector.load %arg6[%c0_65, %c0_66, %c0_67] : memref<1x2x64xf32, #tpu.memory_space<vmem>>, vector<1x2x64xf32>
    %127 = vector.shape_cast %126 : vector<1x2x64xf32> to vector<2x64xf32>
    %128 = vector.shape_cast %125 : vector<2x64xf32> to vector<1x2x64xf32>
    tpu.vector_store %arg6[%c0_65, %c0_66, %c0_67], %128 {strides = array<i32>} : memref<1x2x64xf32, #tpu.memory_space<vmem>>, vector<1x2x64xf32>,
    return
  }
  func.func @transform_0(%arg0: i32) -> (i32, i32, i32, i32) {
    %c0_i32 = arith.constant 0 : i32
    %c0_i32_0 = arith.constant 0 : i32
    %c0_i32_1 = arith.constant 0 : i32
    %c0_i32_2 = arith.constant 0 : i32
    return %arg0, %c0_i32, %c0_i32_0, %c0_i32_1 : i32, i32, i32, i32
  }
  func.func @transform_1(%arg0: i32) -> (i32, i32, i32) {
    %c0_i32 = arith.constant 0 : i32
    %c0_i32_0 = arith.constant 0 : i32
    %c0_i32_1 = arith.constant 0 : i32
    %c0_i32_2 = arith.constant 0 : i32
    return %c0_i32, %c0_i32_0, %c0_i32_1 : i32, i32, i32
  }
  func.func @transform_2(%arg0: i32) -> (i32, i32) {
    %c0_i32 = arith.constant 0 : i32
    %c0_i32_0 = arith.constant 0 : i32
    %c0_i32_1 = arith.constant 0 : i32
    return %c0_i32, %c0_i32_0 : i32, i32
  }
  func.func @transform_3(%arg0: i32) -> (i32, i32) {
    %c0_i32 = arith.constant 0 : i32
    %c0_i32_0 = arith.constant 0 : i32
    %c0_i32_1 = arith.constant 0 : i32
    return %c0_i32, %c0_i32_0 : i32, i32
  }
  func.func @transform_4(%arg0: i32) -> (i32, i32, i32) {
    %c0_i32 = arith.constant 0 : i32
    %c0_i32_0 = arith.constant 0 : i32
    %c0_i32_1 = arith.constant 0 : i32
    %c0_i32_2 = arith.constant 0 : i32
    return %c0_i32, %c0_i32_0, %c0_i32_1 : i32, i32, i32
  }
  func.func @transform_5(%arg0: i32) -> (i32, i32, i32) {
    %c0_i32 = arith.constant 0 : i32
    %c0_i32_0 = arith.constant 0 : i32
    %c0_i32_1 = arith.constant 0 : i32
    return %arg0, %c0_i32, %c0_i32_0 : i32, i32, i32
  }
}

module attributes {stable_mosaic.version = 11 : i64} {
  func.func @_affinity_fuse_kernel(%arg0: i32, %arg1: memref<2x128x8xf32, #tpu.memory_space<vmem>>, %arg2: memref<2x128x8xf32, #tpu.memory_space<vmem>>, %arg3: memref<2x128x8xf32, #tpu.memory_space<vmem>>) attributes {dimension_semantics = [#tpu.dimension_semantics<arbitrary>], iteration_bounds = array<i64: 1>, scalar_prefetch = 0 : i64, scratch_operands = 0 : i64, tpu.core_type = #tpu.core_type<tc>, window_params = [{pipeline_mode = #tpu.pipeline_mode<synchronous>, transform_indices = @transform_0, window_bounds = array<i64: 2, 128, 8>}, {pipeline_mode = #tpu.pipeline_mode<synchronous>, transform_indices = @transform_1, window_bounds = array<i64: 2, 128, 8>}, {pipeline_mode = #tpu.pipeline_mode<synchronous>, transform_indices = @transform_2, window_bounds = array<i64: 2, 128, 8>}]} {
    %c0 = arith.constant 0 : index
    %c0_0 = arith.constant 0 : index
    %c0_1 = arith.constant 0 : index
    %0 = vector.load %arg1[%c0, %c0_0, %c0_1] : memref<2x128x8xf32, #tpu.memory_space<vmem>>, vector<2x128x8xf32>
    %c0_2 = arith.constant 0 : index
    %c0_3 = arith.constant 0 : index
    %c0_4 = arith.constant 0 : index
    %1 = vector.load %arg2[%c0_2, %c0_3, %c0_4] : memref<2x128x8xf32, #tpu.memory_space<vmem>>, vector<2x128x8xf32>
    %cst = arith.constant dense<0.000000e+00> : vector<2x128x128xf32>
    %2 = tpu.matmul %1, %0, %cst {dimension_numbers = #tpu.dot_dimension_numbers<[2], [2], [1], [1], [0, 0, 0, 1, 1, 1], [0], [0]>} : vector<2x128x8xf32>, vector<2x128x8xf32>, vector<2x128x128xf32> -> vector<2x128x128xf32>
    %3 = tpu.iota {dimensions = array<i32: 2>} : vector<2x128x128xi32>
    %c8_i32 = arith.constant 8 : i32
    %4 = vector.broadcast %c8_i32 : i32 to vector<2x128x128xi32>
    %5 = arith.cmpi slt, %3, %4 : vector<2x128x128xi32>
    %cst_5 = arith.constant -1.000000e+30 : f32
    %6 = vector.broadcast %cst_5 : f32 to vector<2x128x128xf32>
    %7 = arith.select %5, %2, %6 : vector<2x128x128xi1>, vector<2x128x128xf32>
    %cst_6 = arith.constant dense<0xFF800000> : vector<2x128xf32>
    %8 = vector.multi_reduction <maximumf>, %7, %cst_6 [2] : vector<2x128x128xf32> to vector<2x128xf32>
    %9 = vector.shape_cast %8 : vector<2x128xf32> to vector<2x128x1xf32>
    %10 = vector.broadcast %9 : vector<2x128x1xf32> to vector<2x128x128xf32>
    %11 = arith.subf %7, %10 : vector<2x128x128xf32>
    %12 = math.exp %11 : vector<2x128x128xf32>
    %cst_7 = arith.constant dense<0.000000e+00> : vector<2x128xf32>
    %13 = vector.multi_reduction <add>, %12, %cst_7 [2] : vector<2x128x128xf32> to vector<2x128xf32>
    %14 = vector.shape_cast %13 : vector<2x128xf32> to vector<2x128x1xf32>
    %15 = tpu.reciprocal %14 {approx = true} : vector<2x128x1xf32> -> vector<2x128x1xf32>
    %16 = vector.broadcast %15 : vector<2x128x1xf32> to vector<2x128x128xf32>
    %17 = arith.mulf %12, %16 : vector<2x128x128xf32>
    %cst_8 = arith.constant dense<0.000000e+00> : vector<2x128x8xf32>
    %18 = tpu.matmul %17, %0, %cst_8 {dimension_numbers = #tpu.dot_dimension_numbers<[2], [1], [1], [2], [0, 0, 0, 1, 1, 2], [0], [0]>} : vector<2x128x128xf32>, vector<2x128x8xf32>, vector<2x128x8xf32> -> vector<2x128x8xf32>
    %19 = arith.addf %18, %1 : vector<2x128x8xf32>
    %c0_9 = arith.constant 0 : index
    %c0_10 = arith.constant 0 : index
    %c0_11 = arith.constant 0 : index
    %20 = vector.load %arg3[%c0_9, %c0_10, %c0_11] : memref<2x128x8xf32, #tpu.memory_space<vmem>>, vector<2x128x8xf32>
    tpu.vector_store %arg3[%c0_9, %c0_10, %c0_11], %19 {strides = array<i32>} : memref<2x128x8xf32, #tpu.memory_space<vmem>>, vector<2x128x8xf32>,
    return
  }
  func.func @transform_0(%arg0: i32) -> (i32, i32, i32) {
    %c0_i32 = arith.constant 0 : i32
    %c0_i32_0 = arith.constant 0 : i32
    %c0_i32_1 = arith.constant 0 : i32
    %c0_i32_2 = arith.constant 0 : i32
    return %c0_i32, %c0_i32_0, %c0_i32_1 : i32, i32, i32
  }
  func.func @transform_1(%arg0: i32) -> (i32, i32, i32) {
    %c0_i32 = arith.constant 0 : i32
    %c0_i32_0 = arith.constant 0 : i32
    %c0_i32_1 = arith.constant 0 : i32
    %c0_i32_2 = arith.constant 0 : i32
    return %c0_i32, %c0_i32_0, %c0_i32_1 : i32, i32, i32
  }
  func.func @transform_2(%arg0: i32) -> (i32, i32, i32) {
    %c0_i32 = arith.constant 0 : i32
    %c0_i32_0 = arith.constant 0 : i32
    %c0_i32_1 = arith.constant 0 : i32
    %c0_i32_2 = arith.constant 0 : i32
    return %c0_i32, %c0_i32_0, %c0_i32_1 : i32, i32, i32
  }
}

</mosaic_0001>

<bundles_post_ra>
// kernel: squeeze.11
= control target key start
LH: loop header
LB: loop body
LE: loop exit
PB: predicated region body
PF: predicated region fallthrough
CT: control target
= control target key end

     0   :  { %s130_s0 = inlined_call_operand.vmem [shape: f32[2,64], index: 0, kind: input, shape index: {}]   ;;  %s131_s1 = inlined_call_operand.hbm [shape: f32[2,1,8,8], index: 1, kind: output, shape index: {}]  }
   0x1   :  { %v5_v0 = vld [vmem:[%s130_s0] sm:$0x3] }
   0x2   :  { %6 = vst [vmem:[#allocation2] sm:$0x3] %v5_v0 }
   0x3   :  { %2 = vsyncpa [#allocation1], 0  ;;  %s98_s0 = smov 120   ;;  %s99_s8 = smov 104   ;;  %vm8_vm0 = vcmask 64512  }
   0x4   :  { %s100_s9 = smov 88   ;;  %s101_s10 = smov 112  }
   0x5   :  { %s102_s11 = smov 96   ;;  %s103_s12 = smov 80  }
   0x6   :  { %s104_s13 = smov 72   ;;  %s105_s14 = smov [#allocation0]  }
   0x7   :  { %s55_s15 = sshll.u32 %s105_s14, 4  ;;  %s57_s1 = sshll.u32 %s131_s1, 4  ;;  %s56_s15 = int_to_ptr.vmem [resolvable:$true] %s55_s15  ;;  %s58_s1 = int_to_ptr.hbm [resolvable:$true] %s57_s1 }
   0x9   :  { %v10_v1 = vld [vmem:[#allocation2] sm:$0x3]  }
   0xa   :  { %v22_v2 = vld [vmem:[#allocation2] sm:$0x3]   ;;  %11 = vrot.lane.b32.xlu0 %v10_v1, %s98_s0 }
   0xb   :  { %23 = vrot.lane.b32.xlu1 %v22_v2, %s99_s8  ;;  %v34_v3 = vld [vmem:[#allocation2] sm:$0x3]  }
   0xc   :  { %35 = vrot.lane.b32.xlu2 %v34_v3, %s100_s9  ;;  %v16_v4 = vld [vmem:[#allocation2] sm:$0x3]  }
   0xd   :  { %v28_v5 = vld [vmem:[#allocation2] sm:$0x3]  }
   0xe   :  { %v40_v6 = vld [vmem:[#allocation2] sm:$0x3]  }
   0xf   :  { %v46_v7 = vld [vmem:[#allocation2] sm:$0x3]  }
  0x10   :  { %v7_v9 = vld [vmem:[#allocation2] sm:$0x3]  }
  0x11   :  { %9 = vst.msk [vmem:[#allocation0] ss:$8 sm:$0x3] %vm8_vm0, %v7_v9  }
  0x12   :  { %17 = vrot.lane.b32.xlu0 %v16_v4, %s101_s10 }
  0x13   :  { %29 = vrot.lane.b32.xlu1 %v28_v5, %s102_s11 }
  0x14   :  { %41 = vrot.lane.b32.xlu2 %v40_v6, %s103_s12 }
  0x1a   :  { %47 = vrot.lane.b32.xlu0 %v46_v7, %s104_s13 }
  0x66   :  { %v36_v8 = vpop.permute.xlu2 %35  }
  0x67   :  { %39 = vst.msk [vmem:[#allocation0 + $0x5] ss:$8 sm:$0x3] %vm8_vm0, %v36_v8  }
  0x6e   :  { %v42_v10 = vpop.permute.xlu2 %41  }
  0x6f   :  { %45 = vst.msk [vmem:[#allocation0 + $0x6] ss:$8 sm:$0x3] %vm8_vm0, %v42_v10  }
  0x7c   :  { %v12_v11 = vpop.permute.xlu0 %11  }
  0x7d   :  { %v24_v12 = vpop.permute.xlu1 %23   ;;  %15 = vst.msk [vmem:[#allocation0 + $0x1] ss:$8 sm:$0x3] %vm8_vm0, %v12_v11  }
  0x7e   :  { %27 = vst.msk [vmem:[#allocation0 + $0x3] ss:$8 sm:$0x3] %vm8_vm0, %v24_v12  }
  0x84   :  { %v18_v13 = vpop.permute.xlu0 %17  }
  0x85   :  { %v30_v14 = vpop.permute.xlu1 %29   ;;  %21 = vst.msk [vmem:[#allocation0 + $0x2] ss:$8 sm:$0x3] %vm8_vm0, %v18_v13  }
  0x86   :  { %33 = vst.msk [vmem:[#allocation0 + $0x4] ss:$8 sm:$0x3] %vm8_vm0, %v30_v14  }
  0x8c   :  { %v48_v15 = vpop.permute.xlu0 %47  }
  0x8d   :  { %51 = vst.msk [vmem:[#allocation0 + $0x7] ss:$8 sm:$0x3] %vm8_vm0, %v48_v15  }
  0x8e   :  { %60 = dma.vmem_to_hbm [thread:$0]  %s56_s15, 256, %s58_s1, [#allocation1]  }
  0x8f   :  { %96 = dma.done.wait [#allocation1], 256  }
  0x90   :  { %97 = vsyncadd [#allocation1], 4294967040 }
  0x91   :  { %63 = vsyncpa [#allocation1], 1 }

// kernel: point_flow_forward.3
= control target key start
LH: loop header
LB: loop body
LE: loop exit
PB: predicated region body
PF: predicated region fallthrough
CT: control target
= control target key end

     0   :  { %s1666_s18 = smov 0   ;;  %s2238_s0 = inlined_call_operand.vmem [shape: f32[2,10,10,8], index: 0, kind: input, shape index: {}]   ;;  %s2239_s1 = inlined_call_operand.vmem [shape: f32[9,8,16], index: 1, kind: input, shape index: {}]   ;;  %s2240_s2 = inlined_call_operand.vmem [shape: f32[1,16], index: 2, kind: input, shape index: {}]   ;;  %s2241_s3 = inlined_call_operand.vmem [shape: f32[1,16], index: 3, kind: input, shape index: {}]   ;;  %s2242_s4 = inlined_call_operand.vmem [shape: f32[9,2,16], index: 4, kind: input, shape index: {}]   ;;  %s2243_s5 = inlined_call_operand.vmem [shape: f32[2,2,64], index: 5, kind: output, shape index: {}]  }
   0x1 LB: > { %s1450_s19 = sadd.s32 4294967295, %s1633_s18   ;;  %p1454_p0 = scmp.ge.s32.totalorder %s1633_s18, 1  ;;  %s1633_s18 = sphi %s1666_s18, %s15_s18  }
   0x2   : > { %p187_p1 = scmp.lt.s32.totalorder %s1633_s18, 3 }
   0x4   : > { %p188_p2 = pnand %p1454_p0, %p187_p1 }
   0x5   : > { %p214_p3 = scmp.lt.s32.totalorder (!%p188_p2), %s1450_s19, 1 }
   0x6   : > { %191 = sbr.rel (%p188_p2) target bundleno = 560 (0x230), region = 40 }
   0xb   : > { %v244_v0 = vld [vmem:[%s2239_s1 + $0x8] sm:$0xff]  ;;  %v243_v1 = vld [vmem:[%s2239_s1] sm:$0xff]  ;;  %v245_v2 = vld [vmem:[%s2239_s1 + $0x10] sm:$0xff]  ;;  %s2245_s19 = smov (!%p214_p3, %s1450_s19), 1  ;;  %vm302_vm0 = vcmask 64512   ;;  %vm277_vm1 = vcmask 1046528  }
   0xc   : > { %334 = vmatpush.msra.mxu0 %v244_v0  ;;  %1612 = vmatpush.msra.mxu3 %v244_v0  ;;  %s1615_s26 = smul.u32 160, %s2245_s19  ;;  %vm417_vm2 = vcmask 1045504   ;;  %v247_v20 = vld [vmem:[%s2239_s1 + $0x20] sm:$0xff]  ;;  %v246_v27 = vld [vmem:[%s2239_s1 + $0x18] sm:$0xff]  ;;  %v249_v41 = vld [vmem:[%s2239_s1 + $0x30] sm:$0xff]  ;;  %vm861_vm3 = vcmask 130048  }
   0xd   : > { %391 = vmatpush.msra.mxu1 %v243_v1  ;;  %473 = vmatpush.msra.mxu2 %v245_v2  ;;  %v248_v50 = vld [vmem:[%s2239_s1 + $0x28] sm:$0xff]  ;;  %vm863_vm4 = vcmask 123904   ;;  %s1456_s16 = sshll.u32 %s2245_s19, 1  ;;  %vm1395_vm5 = vcmask 517120  }
   0xe   : > { %1613 = vmatpush.msrb.mxu3 %v243_v1  ;;  %s1689_s29 = scalar_lea.vmem %s2238_s0, %s1615_s26  ;;  %580 = vmatpush.msrb.mxu0 %v247_v20  ;;  %s222_s21 = scalar_lea.vmem %s2243_s5, %s1456_s16 }
   0xf   : > { %v223_v3 = vld [vmem:[%s1689_s29] sm:$0xff]  ;;  %v224_v4 = vld [vmem:[%s1689_s29 + $0x8] sm:$0x3]  ;;  %v1694_v5 = vld [vmem:[%s1689_s29 + $0x70] sm:$0xff]  ;;  %686 = vmatpush.msrb.mxu2 %v249_v41  ;;  %634 = vmatpush.msrb.mxu1 %v248_v50 }
  0x10   : > { %v278_v6 = vrot.slane %v223_v3, 1  ;;  %v279_v7 = vrot.slane %v224_v4, 1  ;;  %v238_v8 = vld [vmem:[%s1689_s29 + $0x78] sm:$0x3]  ;;  %v299_v9 = vrot.slane %v1694_v5, 1  ;;  %1465 = vmatmul.msk.f32.vlgmr.msra.gmra.mxu1 %vm302_vm0, %v223_v3  ;;  %v418_v10 = vrot.slane %v223_v3, 2 }
  0x11   : > { %v300_v11 = vrot.slane %v238_v8, 1  ;;  %v419_v12 = vrot.slane %v224_v4, 2  ;;  %v225_v13 = vld [vmem:[%s1689_s29 + $0x10] sm:$0xff]  ;;  %v226_v14 = vld [vmem:[%s1689_s29 + $0x18] sm:$0x3]  ;;  %v1721_v25 = vld [vmem:[%s1689_s29 + $0x20] sm:$0xff] }
  0x12   : > { %v280_v15 = vsel %vm277_vm1, %v278_v6, %v279_v7  ;;  %v281_v18 = vrot.slane %v225_v13, 1  ;;  %v282_v19 = vrot.slane %v226_v14, 1  ;;  %v421_v21 = vrot.slane %v225_v13, 2  ;;  %v228_v26 = vld [vmem:[%s1689_s29 + $0x28] sm:$0x3]  ;;  %v1748_v37 = vld [vmem:[%s1689_s29 + $0x30] sm:$0xff] }
  0x13   : > { %1457 = vmatmul.msk.f32.vlgmr.msra.gmra.mxu0 %vm302_vm0, %v280_v15  ;;  %v1704_v16 = vsel %vm277_vm1, %v299_v9, %v300_v11  ;;  %v420_v17 = vsel %vm417_vm2, %v418_v10, %v419_v12  ;;  %v422_v22 = vrot.slane %v226_v14, 2  ;;  %v284_v28 = vrot.slane %v1721_v25, 1  ;;  %v230_v38 = vld [vmem:[%s1689_s29 + $0x38] sm:$0x3]  ;;  %v231_v46 = vld [vmem:[%s1689_s29 + $0x40] sm:$0xff]  ;;  %v233_v55 = vld [vmem:[%s1689_s29 + $0x50] sm:$0xff] }
  0x14   : > { %1464 = vmatmul.msk.f32.vlgmr.msra.gmra.mxu3 %vm302_vm0, %v1704_v16  ;;  %1473 = vmatmul.msk.f32.vlgmr.msra.gmra.mxu2 %vm302_vm0, %v420_v17  ;;  %v1714_v23 = vsel %vm277_vm1, %v281_v18, %v282_v19  ;;  %v285_v29 = vrot.slane %v228_v26, 1  ;;  %v440_v30 = vrot.slane %v238_v8, 2  ;;  %v424_v31 = vrot.slane %v1721_v25, 2  ;;  %v232_v47 = vld [vmem:[%s1689_s29 + $0x48] sm:$0x3]  ;;  %v235_v63 = vld [vmem:[%s1689_s29 + $0x60] sm:$0xff] }
  0x15   : > { %1614 = vmatpush.msra.mxu3 %v245_v2  ;;  %v1718_v24 = vsel %vm417_vm2, %v421_v21, %v422_v22  ;;  %v425_v32 = vrot.slane %v228_v26, 2  ;;  %v439_v33 = vrot.slane %v1694_v5, 2  ;;  %v287_v39 = vrot.slane %v1748_v37, 1  ;;  %v234_v56 = vld [vmem:[%s1689_s29 + $0x58] sm:$0x3]  ;;  %v251_v9 = vld [vmem:[%s2239_s1 + $0x40] sm:$0xff] }
  0x16   : > { %v1737_v34 = vsel %vm277_vm1, %v284_v28, %v285_v29  ;;  %v288_v40 = vrot.slane %v230_v38, 1  ;;  %v427_v42 = vrot.slane %v1748_v37, 2  ;;  %v428_v43 = vrot.slane %v230_v38, 2  ;;  %v236_v0 = vld [vmem:[%s1689_s29 + $0x68] sm:$0x3]  ;;  %v250_v8 = vld [vmem:[%s2239_s1 + $0x38] sm:$0xff]  ;;  %795 = vmatpush.msra.mxu0 %v251_v9 }
  0x17   : > { %v1742_v35 = vsel %vm417_vm2, %v424_v31, %v425_v32  ;;  %v1745_v36 = vsel %vm417_vm2, %v439_v33, %v440_v30  ;;  %v290_v48 = vrot.slane %v231_v46, 1  ;;  %v291_v49 = vrot.slane %v232_v47, 1  ;;  %v239_v10 = vld [vmem:[%s1689_s29 + $0x80] sm:$0xff]  ;;  %v240_v11 = vld [vmem:[%s1689_s29 + $0x88] sm:$0x3]  ;;  %v241_v18 = vld [vmem:[%s1689_s29 + $0x90] sm:$0xff] }
  0x18   : > { %1466 = vmatmul.msk.f32.gmra.mxu1 %vm302_vm0, %v225_v13  ;;  %v1763_v44 = vsel %vm277_vm1, %v287_v39, %v288_v40  ;;  %v1768_v45 = vsel %vm417_vm2, %v427_v42, %v428_v43  ;;  %v430_v51 = vrot.slane %v231_v46, 2  ;;  %v431_v52 = vrot.slane %v232_v47, 2  ;;  %v242_v22 = vld [vmem:[%s1689_s29 + $0x98] sm:$0x3] }
  0x19   : > { %v1781_v53 = vsel %vm277_vm1, %v290_v48, %v291_v49  ;;  %v293_v57 = vrot.slane %v233_v55, 1  ;;  %v294_v58 = vrot.slane %v234_v56, 1  ;;  %v433_v59 = vrot.slane %v233_v55, 2 }
  0x1a   : > { %v1785_v54 = vsel %vm417_vm2, %v430_v51, %v431_v52  ;;  %v434_v60 = vrot.slane %v234_v56, 2  ;;  %v296_v1 = vrot.slane %v235_v63, 1  ;;  %v297_v2 = vrot.slane %v236_v0, 1 }
  0x1b   : > { %1458 = vmatmul.msk.f32.gmra.mxu0 %vm302_vm0, %v1714_v23  ;;  %v295_v61 = vsel %vm277_vm1, %v293_v57, %v294_v58  ;;  %v436_v3 = vrot.slane %v235_v63, 2  ;;  %v437_v4 = vrot.slane %v236_v0, 2  ;;  %v614_v12 = vrot.slane %v239_v10, 2 }
  0x1c   : > { %1472 = vmatmul.msk.f32.vlgmr.msrb.gmra.mxu3 %vm302_vm0, %v1694_v5  ;;  %1474 = vmatmul.msk.f32.gmra.mxu2 %vm302_vm0, %v1718_v24  ;;  %v1798_v62 = vsel %vm417_vm2, %v433_v59, %v434_v60  ;;  %v298_v6 = vsel %vm277_vm1, %v296_v1, %v297_v2  ;;  %v560_v14 = vrot.slane %v239_v10, 1  ;;  %v775_v40 = vrot.slane %v241_v18, 2 }
  0x1d   : > { %525 = vmatpush.msrb.mxu3 %v246_v27  ;;  %v1810_v7 = vsel %vm417_vm2, %v436_v3, %v437_v4  ;;  %v776_v41 = vrot.slane %v242_v22, 2  ;;  %v1635_v1 = vmov 0.0  }
  0x1e   : > { %865 = vst.msk [vmem:[#allocation2 + $0x10] sm:$0xff] %vm861_vm3, %v1635_v1 }
  0x1f   : > { %866 = vst.msk [vmem:[#allocation2 + $0x18] sm:$0x3] %vm863_vm4, %v1635_v1 }
  0x20   : > { %1467 = vmatmul.msk.f32.gmra.mxu1 %vm302_vm0, %v1721_v25  ;;  %862 = vst.msk [vmem:[#allocation2] sm:$0xff] %vm861_vm3, %v1635_v1 }
  0x21   : > { %864 = vst.msk [vmem:[#allocation2 + $0x8] sm:$0x3] %vm863_vm4, %v1635_v1 }
  0x22   : > { %867 = vst.msk [vmem:[#allocation2 + $0x20] sm:$0xff] %vm861_vm3, %v1635_v1 }
  0x23   : > { %1459 = vmatmul.msk.f32.gmra.mxu0 %vm302_vm0, %v1737_v34  ;;  %868 = vst.msk [vmem:[#allocation2 + $0x28] sm:$0x3] %vm863_vm4, %v1635_v1 }
  0x24   : > { %1475 = vmatmul.msk.f32.gmra.mxu2 %vm302_vm0, %v1742_v35  ;;  %1480 = vmatmul.msk.f32.vlgmr.msra.gmra.mxu3 %vm302_vm0, %v1745_v36  ;;  %869 = vst.msk [vmem:[#allocation2 + $0x30] sm:$0xff] %vm861_vm3, %v1635_v1 }
  0x25   : > { %741 = vmatpush.msra.mxu3 %v250_v8  ;;  %870 = vst.msk [vmem:[#allocation2 + $0x38] sm:$0x3] %vm863_vm4, %v1635_v1 }
  0x26   : > { %871 = vst.msk [vmem:[#allocation2 + $0x40] sm:$0xff] %vm861_vm3, %v1635_v1 }
  0x27   : > { %872 = vst.msk [vmem:[#allocation2 + $0x48] sm:$0x3] %vm863_vm4, %v1635_v1 }
  0x28   : > { %1468 = vmatmul.msk.f32.gmra.mxu1 %vm302_vm0, %v1748_v37  ;;  %873 = vst.msk [vmem:[#allocation2 + $0x50] sm:$0xff] %vm861_vm3, %v1635_v1 }
  0x29   : > { %874 = vst.msk [vmem:[#allocation2 + $0x58] sm:$0x3] %vm863_vm4, %v1635_v1 }
  0x2a   : > { %875 = vst.msk [vmem:[#allocation2 + $0x60] sm:$0xff] %vm861_vm3, %v1635_v1 }
  0x2b   : > { %1460 = vmatmul.msk.f32.gmra.mxu0 %vm302_vm0, %v1763_v44  ;;  %876 = vst.msk [vmem:[#allocation2 + $0x68] sm:$0x3] %vm863_vm4, %v1635_v1 }
  0x2c   : > { %1476 = vmatmul.msk.f32.gmra.mxu2 %vm302_vm0, %v1768_v45  ;;  %1481 = vmatmul.msk.f32.vlgmr.msrb.gmra.mxu3 %vm302_vm0, %v225_v13  ;;  %v615_v13 = vrot.slane %v240_v11, 2  ;;  %877 = vst.msk [vmem:[#allocation2 + $0x70] sm:$0xff] %vm861_vm3, %v1635_v1 }
  0x2d   : > { %878 = vst.msk [vmem:[#allocation2 + $0x78] sm:$0x3] %vm863_vm4, %v1635_v1 }
  0x2e   : > { %v616_v15 = vsel %vm417_vm2, %v614_v12, %v615_v13  ;;  %879 = vst.msk [vmem:[#allocation2 + $0x80] sm:$0xff] %vm861_vm3, %v1635_v1 }
  0x2f   : > { %880 = vst.msk [vmem:[#allocation2 + $0x88] sm:$0x3] %vm863_vm4, %v1635_v1 }
  0x30   : > { %1469 = vmatmul.msk.f32.gmra.mxu1 %vm302_vm0, %v231_v46  ;;  %881 = vst.msk [vmem:[#allocation2 + $0x90] sm:$0xff] %vm861_vm3, %v1635_v1 }
  0x31   : > { %882 = vst.msk [vmem:[#allocation2 + $0x98] sm:$0x3] %vm863_vm4, %v1635_v1 }
  0x33   : > { %1461 = vmatmul.msk.f32.gmra.mxu0 %vm302_vm0, %v1781_v53 }
  0x34   : > { %1477 = vmatmul.msk.f32.gmra.mxu2 %vm302_vm0, %v1785_v54  ;;  %1482 = vmatmul.msk.f32.gmra.mxu3 %vm302_vm0, %v1721_v25 }
  0x38   : > { %1470 = vmatmul.msk.f32.gmra.mxu1 %vm302_vm0, %v233_v55 }
  0x3b   : > { %1462 = vmatmul.msk.f32.gmra.mxu0 %vm302_vm0, %v295_v61 }
  0x3c   : > { %1478 = vmatmul.msk.f32.gmra.mxu2 %vm302_vm0, %v1798_v62  ;;  %1483 = vmatmul.msk.f32.gmra.mxu3 %vm302_vm0, %v1748_v37 }
  0x40   : > { %1471 = vmatmul.msk.f32.gmra.mxu1 %vm302_vm0, %v235_v63 }
  0x43   : > { %1463 = vmatmul.msk.f32.gmra.mxu0 %vm302_vm0, %v298_v6 }
  0x44   : > { %1479 = vmatmul.msk.f32.gmra.mxu2 %vm302_vm0, %v1810_v7  ;;  %1484 = vmatmul.msk.f32.gmra.mxu3 %vm302_vm0, %v231_v46 }
  0x48   : > { %1497 = vmatmul.msk.f32.vlgmr.msrb.gmra.mxu1 %vm302_vm0, %v1718_v24  ;;  %v722_v24 = vrot.slane %v242_v22, 1 }
  0x4b   : > { %1489 = vmatmul.msk.f32.vlgmr.msrb.gmra.mxu0 %vm302_vm0, %v1714_v23  ;;  %v721_v23 = vrot.slane %v241_v18, 1 }
  0x4c   : > { %1485 = vmatmul.msk.f32.gmra.mxu3 %vm302_vm0, %v233_v55  ;;  %1505 = vmatmul.msk.f32.vlgmr.msrb.gmra.mxu2 %vm302_vm0, %v1721_v25 }
  0x4d   : > { %v723_v28 = vsel %vm277_vm1, %v721_v23, %v722_v24  ;;  %v1994_v24 = vld [vmem:[%s2240_s2] ss:$0 sm:$0xff] }
  0x50   : > { %1498 = vmatmul.msk.f32.gmra.mxu1 %vm302_vm0, %v1742_v35 }
  0x53   : > { %1490 = vmatmul.msk.f32.gmra.mxu0 %vm302_vm0, %v1737_v34 }
  0x54   : > { %1486 = vmatmul.msk.f32.gmra.mxu3 %vm302_vm0, %v235_v63  ;;  %1506 = vmatmul.msk.f32.gmra.mxu2 %vm302_vm0, %v1748_v37 }
  0x58   : > { %1499 = vmatmul.msk.f32.gmra.mxu1 %vm302_vm0, %v1768_v45 }
  0x5b   : > { %1491 = vmatmul.msk.f32.gmra.mxu0 %vm302_vm0, %v1763_v44 }
  0x5c   : > { %1487 = vmatmul.msk.f32.gmra.mxu3 %vm302_vm0, %v1694_v5  ;;  %1507 = vmatmul.msk.f32.gmra.mxu2 %vm302_vm0, %v231_v46 }
  0x60   : > { %1500 = vmatmul.msk.f32.gmra.mxu1 %vm302_vm0, %v1785_v54 }
  0x63   : > { %1492 = vmatmul.msk.f32.gmra.mxu0 %vm302_vm0, %v1781_v53 }
  0x64   : > { %1488 = vmatmul.msk.f32.gmra.mxu3 %vm302_vm0, %v239_v10  ;;  %1508 = vmatmul.msk.f32.gmra.mxu2 %vm302_vm0, %v233_v55 }
  0x68   : > { %1501 = vmatmul.msk.f32.gmra.mxu1 %vm302_vm0, %v1798_v62 }
  0x6b   : > { %1493 = vmatmul.msk.f32.gmra.mxu0 %vm302_vm0, %v295_v61 }
  0x6c   : > { %1509 = vmatmul.msk.f32.gmra.mxu2 %vm302_vm0, %v235_v63  ;;  %1513 = vmatmul.msk.f32.vlgmr.msra.gmra.mxu3 %vm302_vm0, %v1737_v34 }
  0x70   : > { %1502 = vmatmul.msk.f32.gmra.mxu1 %vm302_vm0, %v1810_v7 }
  0x73   : > { %1494 = vmatmul.msk.f32.gmra.mxu0 %vm302_vm0, %v298_v6 }
  0x74   : > { %1510 = vmatmul.msk.f32.gmra.mxu2 %vm302_vm0, %v1694_v5  ;;  %1514 = vmatmul.msk.f32.gmra.mxu3 %vm302_vm0, %v1763_v44  ;;  %v561_v5 = vrot.slane %v240_v11, 1  ;;  %v777_v44 = vsel %vm417_vm2, %v775_v40, %v776_v41 }
  0x76   : > { %v562_v17 = vsel %vm277_vm1, %v560_v14, %v561_v5 }
  0x78   : > { %1503 = vmatmul.msk.f32.gmra.mxu1 %vm302_vm0, %v1745_v36 }
  0x7b   : > { %1495 = vmatmul.msk.f32.gmra.mxu0 %vm302_vm0, %v1704_v16 }
  0x7c   : > { %1511 = vmatmul.msk.f32.gmra.mxu2 %vm302_vm0, %v239_v10  ;;  %1515 = vmatmul.msk.f32.gmra.mxu3 %vm302_vm0, %v1781_v53 }
  0x80   : > { %1504 = vmatmul.msk.f32.gmra.mxu1 %vm302_vm0, %v616_v15 }
  0x83   : > { %1496 = vmatmul.msk.f32.gmra.mxu0 %vm302_vm0, %v562_v17 }
  0x84   : > { %1512 = vmatmul.msk.f32.gmra.mxu2 %vm302_vm0, %v241_v18  ;;  %1516 = vmatmul.msk.f32.gmra.mxu3 %vm302_vm0, %v295_v61 }
  0x8b   : > { %1521 = vmatmul.msk.f32.vlgmr.msra.gmra.mxu0 %vm302_vm0, %v1742_v35 }
  0x8c   : > { %1517 = vmatmul.msk.f32.gmra.mxu3 %vm302_vm0, %v298_v6 }
  0x8d   : > { %v393_v31 = vpop.f32.mrf.mxu1 }
  0x90   : > { %v1881_v19 = vpop.f32.mrf.mxu0 }
  0x93   : > { %1522 = vmatmul.msk.f32.gmra.mxu0 %vm302_vm0, %v1768_v45 }
  0x94   : > { %1518 = vmatmul.msk.f32.gmra.mxu3 %vm302_vm0, %v1704_v16 }
  0x95   : > { %v1909_v35 = vpop.f32.mrf.mxu1 }
  0x97   : > { %v357_v20 = vpop.f32.mrf.mxu3  ;;  %v475_v32 = vpop.f32.mrf.mxu2 }
  0x98   : > { %v1887_v21 = vpop.f32.mrf.mxu0 }
  0x99   : > { %v397_v5 = vadd.f32 %v1909_v35, %v1887_v21 }
  0x9b   : > { %1523 = vmatmul.msk.f32.gmra.mxu0 %vm302_vm0, %v1785_v54 }
  0x9c   : > { %1519 = vmatmul.msk.f32.gmra.mxu3 %vm302_vm0, %v562_v17 }
  0x9d   : > { %v1923_v45 = vpop.f32.mrf.mxu1 }
  0x9f   : > { %v414_v25 = vpop.f32.mrf.mxu3  ;;  %v1913_v38 = vpop.f32.mrf.mxu2 }
  0xa0   : > { %v415_v26 = vadd.f32 %v414_v25, %v357_v20  ;;  %v1893_v27 = vpop.f32.mrf.mxu0 }
  0xa3   : > { %1524 = vmatmul.msk.f32.gmra.mxu0 %vm302_vm0, %v1798_v62 }
  0xa4   : > { %1520 = vmatmul.msk.f32.gmra.mxu3 %vm302_vm0, %v723_v28 }
  0xa5   : > { %v1930_v48 = vpop.f32.mrf.mxu1 }
  0xa7   : > { %v496_v16 = vpop.f32.mrf.mxu3 }
  0xa8   : > { %v1899_v29 = vadd.f32 %v496_v16, %v415_v26  ;;  %v1901_v30 = vpop.f32.mrf.mxu0  ;;  %v400_v26 = vadd.f32 %v1923_v45, %v1893_v27  ;;  %v2001_v16 = vld [vmem:[%s2241_s3] ss:$0 sm:$0xff] }
  0xab   : > { %1525 = vmatmul.msk.f32.gmra.mxu0 %vm302_vm0, %v1810_v7  ;;  %v394_v7 = vadd.f32 %v393_v31, %v1881_v19 }
  0xad   : > { %v1936_v52 = vpop.f32.mrf.mxu1  ;;  %v499_v8 = vadd.f32 %v475_v32, %v394_v7 }
  0xaf   : > { %v527_v33 = vpop.f32.mrf.mxu3 }
  0xb0   : > { %v1905_v34 = vpop.f32.mrf.mxu0  ;;  %v551_v10 = vadd.f32 %v527_v33, %v499_v8 }
  0xb3   : > { %1526 = vmatmul.msk.f32.gmra.mxu0 %vm302_vm0, %v1745_v36  ;;  %v1925_v36 = vpop.f32.mrf.mxu2 }
  0xb4   : > { %v501_v32 = vadd.f32 %v1925_v36, %v400_v26 }
  0xb5   : > { %v1944_v56 = vpop.f32.mrf.mxu1 }
  0xb7   : > { %v1911_v37 = vpop.f32.mrf.mxu3 }
  0xb8   : > { %v1915_v39 = vpop.f32.mrf.mxu0 }
  0xbb   : > { %1527 = vmatmul.msk.f32.gmra.mxu0 %vm302_vm0, %v616_v15  ;;  %v1932_v49 = vpop.f32.mrf.mxu2  ;;  %v500_v15 = vadd.f32 %v1913_v38, %v397_v5 }
  0xbd   : > { %v1954_v61 = vpop.f32.mrf.mxu1  ;;  %v552_v18 = vadd.f32 %v1911_v37, %v500_v15 }
  0xbf   : > { %v1918_v42 = vpop.f32.mrf.mxu3 }
  0xc0   : > { %v1920_v43 = vpop.f32.mrf.mxu0  ;;  %v553_v37 = vadd.f32 %v1918_v42, %v501_v32 }
  0xc3   : > { %1528 = vmatmul.msk.f32.gmra.mxu0 %vm302_vm0, %v777_v44  ;;  %v1938_v53 = vpop.f32.mrf.mxu2 }
  0xc5   : > { %v636_v2 = vpop.f32.mrf.mxu1 }
  0xc7   : > { %v1928_v46 = vpop.f32.mrf.mxu3 }
  0xc8   : > { %v582_v47 = vpop.f32.mrf.mxu0 }
  0xc9   : > { %v606_v12 = vadd.f32 %v582_v47, %v551_v10 }
  0xcb   : > { %v1946_v57 = vpop.f32.mrf.mxu2  ;;  %v660_v17 = vadd.f32 %v636_v2, %v606_v12 }
  0xcd   : > { %v639_v9 = vpop.f32.mrf.mxu1 }
  0xcf   : > { %v1934_v50 = vpop.f32.mrf.mxu3 }
  0xd0   : > { %v585_v51 = vpop.f32.mrf.mxu0 }
  0xd1   : > { %v607_v22 = vadd.f32 %v585_v51, %v552_v18  ;;  %v403_v51 = vadd.f32 %v1930_v48, %v1901_v30  ;;  %v406_v48 = vadd.f32 %v1936_v52, %v1905_v34 }
  0xd3   : > { %v1956_v62 = vpop.f32.mrf.mxu2  ;;  %v661_v33 = vadd.f32 %v639_v9, %v607_v22  ;;  %v502_v2 = vadd.f32 %v1932_v49, %v403_v51 }
  0xd5   : > { %v642_v20 = vpop.f32.mrf.mxu1  ;;  %v554_v7 = vadd.f32 %v1928_v46, %v502_v2 }
  0xd7   : > { %v1940_v54 = vpop.f32.mrf.mxu3 }
  0xd8   : > { %v1942_v55 = vpop.f32.mrf.mxu0 }
  0xd9   : > { %v608_v41 = vadd.f32 %v1942_v55, %v553_v37 }
  0xdb   : > { %v688_v3 = vpop.f32.mrf.mxu2 }
  0xdc   : > { %v712_v19 = vadd.f32 %v688_v3, %v660_v17  ;;  %v662_v3 = vadd.f32 %v642_v20, %v608_v41 }
  0xdd   : > { %v645_v45 = vpop.f32.mrf.mxu1 }
  0xdf   : > { %v1950_v59 = vpop.f32.mrf.mxu3 }
  0xe0   : > { %v1948_v58 = vpop.f32.mrf.mxu0 }
  0xe1   : > { %v609_v9 = vadd.f32 %v1948_v58, %v554_v7 }
  0xe3   : > { %v691_v11 = vpop.f32.mrf.mxu2  ;;  %v663_v5 = vadd.f32 %v645_v45, %v609_v9  ;;  %v1234_v45 = vld [vmem:[#allocation2 + $0x90] sm:$0xff] }
  0xe4   : > { %v713_v38 = vadd.f32 %v691_v11, %v661_v33  ;;  %1583 = vmatpush.xpose.msk.msrb.mxu0 %vm861_vm3, %v1234_v45  ;;  %v1290_v45 = vld [vmem:[#allocation2 + $0x91] sm:$0xff] }
  0xe5   : > { %v648_v12 = vpop.f32.mrf.mxu1 }
  0xe7   : > { %v1958_v63 = vpop.f32.mrf.mxu3 }
  0xe8   : > { %v1952_v60 = vpop.f32.mrf.mxu0 }
  0xeb   : > { %v694_v21 = vpop.f32.mrf.mxu2 }
  0xec   : > { %v714_v55 = vadd.f32 %v694_v21, %v662_v3 }
  0xed   : > { %v651_v26 = vpop.f32.mrf.mxu1 }
  0xef   : > { %v743_v4 = vpop.f32.mrf.mxu3 }
  0xf0   : > { %v1960_v0 = vpop.f32.mrf.mxu0  ;;  %v767_v23 = vadd.f32 %v743_v4, %v712_v19 }
  0xf3   : > { %v697_v1 = vpop.f32.mrf.mxu2 }
  0xf4   : > { %v715_v18 = vadd.f32 %v697_v1, %v663_v5 }
  0xf7   : > { %v746_v13 = vpop.f32.mrf.mxu3 }
  0xf8   : > { %v1970_v6 = vpop.f32.mrf.mxu0  ;;  %v768_v27 = vadd.f32 %v746_v13, %v713_v38  ;;  %v503_v13 = vadd.f32 %v1938_v53, %v406_v48  ;;  %v412_v38 = vadd.f32 %v1954_v61, %v1920_v43 }
  0xfa   : > { %v555_v17 = vadd.f32 %v1934_v50, %v503_v13 }
  0xfb   : > { %v700_v15 = vpop.f32.mrf.mxu2 }
  0xfc   : > { %v610_v20 = vadd.f32 %v1952_v60, %v555_v17 }
  0xff   : > { %v749_v31 = vpop.f32.mrf.mxu3 }
 0x100   : > { %v1981_v14 = vpop.f32.mrf.mxu0  ;;  %v769_v10 = vadd.f32 %v749_v31, %v714_v55 }
 0x103   : > { %v703_v32 = vpop.f32.mrf.mxu2 }
 0x107   : > { %v752_v4 = vpop.f32.mrf.mxu3 }
 0x108   : > { %v797_v25 = vpop.f32.mrf.mxu0  ;;  %v770_v22 = vadd.f32 %v752_v4, %v715_v18 }
 0x109   : > { %v821_v28 = vadd.f32 %v797_v25, %v767_v23  ;;  %v409_v23 = vadd.f32 %v1944_v56, %v1915_v39  ;;  %v664_v25 = vadd.f32 %v648_v12, %v610_v20 }
 0x10b   : > { %v833_v35 = vmul.f32 %v1994_v24, %v821_v28  ;;  %v504_v21 = vadd.f32 %v1946_v57, %v409_v23  ;;  %v716_v31 = vadd.f32 %v700_v15, %v664_v25 }
 0x10d   : > { %v845_v40 = vadd.f32 %v2001_v16, %v833_v35  ;;  %v556_v28 = vadd.f32 %v1940_v54, %v504_v21 }
 0x10f   : > { %v853_v44 = vmax.f32 %v845_v40, 0.0  ;;  %v755_v19 = vpop.f32.mrf.mxu3  ;;  %v611_v33 = vadd.f32 %v1960_v0, %v556_v28  ;;  %v505_v40 = vadd.f32 %v1956_v62, %v412_v38  ;;  %v892_v38 = vld [vmem:[#allocation2] sm:$0xff] }
 0x110   : > { %v800_v47 = vpop.f32.mrf.mxu0  ;;  %v771_v35 = vadd.f32 %v755_v19, %v716_v31 }
 0x111   : > { %884 = vst.msk [vmem:[#allocation2 + $0x11] sm:$0xff] %vm861_vm3, %v853_v44  ;;  %v822_v36 = vadd.f32 %v800_v47, %v768_v27  ;;  %v665_v41 = vadd.f32 %v651_v26, %v611_v33  ;;  %v557_v27 = vadd.f32 %v1950_v59, %v505_v40  ;;  %v654_v47 = vpop.f32.mrf.mxu1  ;;  %v253_v40 = vld [vmem:[%s2242_s4 + $0x2] sm:$0x3] }
 0x113   : > { %v834_v42 = vmul.f32 %v1994_v24, %v822_v36  ;;  %v717_v44 = vadd.f32 %v703_v32, %v665_v41  ;;  %v612_v51 = vadd.f32 %v1970_v6, %v557_v27  ;;  %v706_v36 = vpop.f32.mrf.mxu2  ;;  %v254_v27 = vld [vmem:[%s2242_s4 + $0x4] sm:$0x3] }
 0x115   : > { %v846_v8 = vadd.f32 %v2001_v16, %v834_v42  ;;  %v666_v3 = vadd.f32 %v654_v47, %v612_v51  ;;  %v558_v42 = vadd.f32 %v1958_v63, %v1899_v29  ;;  %v1346_v47 = vld [vmem:[#allocation2 + $0x92] sm:$0xff]  ;;  %v256_v51 = vld [vmem:[%s2242_s4 + $0x8] sm:$0x3] }
 0x117   : > { %v854_v11 = vmax.f32 %v846_v8, 0.0  ;;  %v758_v39 = vpop.f32.mrf.mxu3  ;;  %v718_v4 = vadd.f32 %v706_v36, %v666_v3  ;;  %v613_v55 = vadd.f32 %v1981_v14, %v558_v42  ;;  %v259_v36 = vld [vmem:[%s2242_s4 + $0xe] sm:$0x3] }
 0x118   : > { %v803_v30 = vpop.f32.mrf.mxu0  ;;  %v772_v43 = vadd.f32 %v758_v39, %v717_v44  ;;  %v1003_v39 = vld [vmem:[#allocation2 + $0x12] sm:$0xff] }
 0x119   : > { %885 = vst.msk [vmem:[#allocation2 + $0x21] sm:$0xff] %vm861_vm3, %v854_v11  ;;  %v823_v49 = vadd.f32 %v803_v30, %v769_v10  ;;  %v657_v9 = vpop.f32.mrf.mxu1 }
 0x11a   : > { %v667_v48 = vadd.f32 %v657_v9, %v613_v55 }
 0x11b   : > { %v835_v46 = vmul.f32 %v1994_v24, %v823_v49  ;;  %v709_v30 = vpop.f32.mrf.mxu2 }
 0x11c   : > { %v719_v13 = vadd.f32 %v709_v30, %v667_v48 }
 0x11d   : > { %v847_v58 = vadd.f32 %v2001_v16, %v835_v46 }
 0x11f   : > { %v855_v34 = vmax.f32 %v847_v58, 0.0  ;;  %v761_v2 = vpop.f32.mrf.mxu3 }
 0x120   : > { %v806_v52 = vpop.f32.mrf.mxu0  ;;  %v773_v6 = vadd.f32 %v761_v2, %v718_v4  ;;  %v894_v32 = vld [vmem:[#allocation2 + $0x20] sm:$0xff] }
 0x121   : > { %886 = vst.msk [vmem:[#allocation2 + $0x31] sm:$0xff] %vm861_vm3, %v855_v34  ;;  %v824_v53 = vadd.f32 %v806_v52, %v770_v22  ;;  %v2115_v33 = vld [vmem:[#allocation2 + $0x22] sm:$0xff] }
 0x123   : > { %v836_v50 = vmul.f32 %v1994_v24, %v824_v53 }
 0x125   : > { %v848_v60 = vadd.f32 %v2001_v16, %v836_v50 }
 0x127   : > { %v856_v37 = vmax.f32 %v848_v60, 0.0  ;;  %v764_v12 = vpop.f32.mrf.mxu3  ;;  %v2110_v60 = vld [vmem:[#allocation2 + $0x21] sm:$0xff] }
 0x128   : > { %v809_v56 = vpop.f32.mrf.mxu0  ;;  %v774_v63 = vadd.f32 %v764_v12, %v719_v13  ;;  %v2099_v26 = vld [vmem:[#allocation2 + $0x31] sm:$0xff] }
 0x129   : > { %887 = vst.msk [vmem:[#allocation2 + $0x41] sm:$0xff] %vm861_vm3, %v856_v37  ;;  %v825_v57 = vadd.f32 %v809_v56, %v771_v35  ;;  %v895_v28 = vld [vmem:[#allocation2 + $0x30] sm:$0xff]  ;;  %v900_v56 = vld [vmem:[#allocation2 + $0x1] sm:$0xff] }
 0x12a   : > { %v2104_v31 = vld [vmem:[#allocation2 + $0x32] sm:$0xff] }
 0x12b   : > { %v837_v54 = vmul.f32 %v1994_v24, %v825_v57  ;;  %v901_v35 = vld [vmem:[#allocation2 + $0x11] sm:$0xff]  ;;  %v1002_v57 = vld [vmem:[#allocation2 + $0x2] sm:$0xff] }
 0x12c   : > { %v893_v37 = vld [vmem:[#allocation2 + $0x10] sm:$0xff] }
 0x12d   : > { %v849_v0 = vadd.f32 %v2001_v16, %v837_v54  ;;  %v252_v54 = vld [vmem:[%s2242_s4] sm:$0x3] }
 0x12f   : > { %v857_v61 = vmax.f32 %v849_v0, 0.0  ;;  %v258_v0 = vld [vmem:[%s2242_s4 + $0xc] sm:$0x3] }
 0x130   : > { %v812_v1 = vpop.f32.mrf.mxu0  ;;  %v2088_v21 = vld [vmem:[#allocation2 + $0x41] sm:$0xff] }
 0x131   : > { %888 = vst.msk [vmem:[#allocation2 + $0x51] sm:$0xff] %vm861_vm3, %v857_v61  ;;  %v826_v62 = vadd.f32 %v812_v1, %v772_v43  ;;  %v896_v25 = vld [vmem:[#allocation2 + $0x40] sm:$0xff]  ;;  %v257_v61 = vld [vmem:[%s2242_s4 + $0xa] sm:$0x3]  ;;  %v260_v1 = vld [vmem:[%s2242_s4 + $0x10] sm:$0x3] }
 0x132   : > { %v2093_v50 = vld [vmem:[#allocation2 + $0x42] sm:$0xff] }
 0x133   : > { %v838_v59 = vmul.f32 %v1994_v24, %v826_v62  ;;  %v255_v43 = vld [vmem:[%s2242_s4 + $0x6] sm:$0x3] }
 0x135   : > { %v850_v7 = vadd.f32 %v2001_v16, %v838_v59 }
 0x137   : > { %v858_v8 = vmax.f32 %v850_v7, 0.0 }
 0x138   : > { %v815_v10 = vpop.f32.mrf.mxu0  ;;  %v2078_v34 = vld [vmem:[#allocation2 + $0x51] sm:$0xff] }
 0x139   : > { %889 = vst.msk [vmem:[#allocation2 + $0x61] sm:$0xff] %vm861_vm3, %v858_v8  ;;  %v827_v11 = vadd.f32 %v815_v10, %v773_v6  ;;  %v897_v52 = vld [vmem:[#allocation2 + $0x50] sm:$0xff] }
 0x13a   : > { %v2083_v53 = vld [vmem:[#allocation2 + $0x52] sm:$0xff] }
 0x13b   : > { %v839_v49 = vmul.f32 %v1994_v24, %v827_v11 }
 0x13d   : > { %v851_v29 = vadd.f32 %v2001_v16, %v839_v49 }
 0x13f   : > { %v859_v5 = vmax.f32 %v851_v29, 0.0 }
 0x140   : > { %v818_v46 = vpop.f32.mrf.mxu0  ;;  %v2074_v22 = vld [vmem:[#allocation2 + $0x62] sm:$0xff] }
 0x141   : > { %890 = vst.msk [vmem:[#allocation2 + $0x71] sm:$0xff] %vm861_vm3, %v859_v5  ;;  %v828_v14 = vadd.f32 %v818_v46, %v774_v63 }
 0x143   : > { %v840_v15 = vmul.f32 %v1994_v24, %v828_v14  ;;  %v2066_v24 = vld [vmem:[#allocation2 + $0x61] sm:$0xff] }
 0x145   : > { %v852_v17 = vadd.f32 %v2001_v16, %v840_v15  ;;  %v2068_v16 = vld [vmem:[#allocation2 + $0x60] sm:$0xff] }
 0x147   : > { %v860_v18 = vmax.f32 %v852_v17, 0.0 }
 0x148   : > { %v2053_v58 = vld [vmem:[#allocation2 + $0x71] sm:$0xff] }
 0x149   : > { %v2055_v19 = vld [vmem:[#allocation2 + $0x70] sm:$0xff]  ;;  %891 = vst.msk [vmem:[#allocation2 + $0x81] sm:$0xff] %vm861_vm3, %v860_v18  ;;  %1529 = vmatpush.xpose.msk.msra.mxu1 %vm861_vm3, %v2053_v58 }
 0x14a   : > { %v2057_v20 = vld [vmem:[#allocation2 + $0x72] sm:$0xff]  ;;  %1538 = vmatpush.xpose.msk.msra.mxu2 %vm861_vm3, %v2055_v19 }
 0x14b   : > { %1547 = vmatpush.xpose.msk.msrb.mxu3 %vm861_vm3, %v2057_v20 }
 0x14d   : > { %1530 = vmatpush.xpose.msk.msra.mxu1 %vm861_vm3, %v2066_v24 }
 0x14e   : > { %1539 = vmatpush.xpose.msk.msra.mxu2 %vm861_vm3, %v2068_v16 }
 0x14f   : > { %1548 = vmatpush.xpose.msk.msrb.mxu3 %vm861_vm3, %v2074_v22 }
 0x150   : > { %v1233_v23 = vld [vmem:[#allocation2 + $0x80] sm:$0xff] }
 0x151   : > { %1531 = vmatpush.xpose.msk.msra.mxu1 %vm861_vm3, %v2078_v34  ;;  %1584 = vmatpush.xpose.msk.msrb.mxu0 %vm861_vm3, %v1233_v23  ;;  %v1121_v41 = vld [vmem:[#allocation2 + $0x81] sm:$0xff] }
 0x152   : > { %1540 = vmatpush.xpose.msk.msra.mxu2 %vm861_vm3, %v897_v52  ;;  %v1177_v44 = vld [vmem:[#allocation2 + $0x82] sm:$0xff] }
 0x153   : > { %1549 = vmatpush.xpose.msk.msrb.mxu3 %vm861_vm3, %v2083_v53 }
 0x155   : > { %1532 = vmatpush.xpose.msk.msra.mxu1 %vm861_vm3, %v2088_v21  ;;  %1585 = vmatpush.xpose.msk.msrb.mxu0 %vm861_vm3, %v2055_v19 }
 0x156   : > { %1541 = vmatpush.xpose.msk.msra.mxu2 %vm861_vm3, %v896_v25 }
 0x157   : > { %1550 = vmatpush.xpose.msk.msrb.mxu3 %vm861_vm3, %v2093_v50 }
 0x159   : > { %1533 = vmatpush.xpose.msk.msra.mxu1 %vm861_vm3, %v2099_v26  ;;  %1586 = vmatpush.xpose.msk.msrb.mxu0 %vm861_vm3, %v2068_v16 }
 0x15a   : > { %1542 = vmatpush.xpose.msk.msra.mxu2 %vm861_vm3, %v895_v28 }
 0x15b   : > { %1551 = vmatpush.xpose.msk.msrb.mxu3 %vm861_vm3, %v2104_v31 }
 0x15d   : > { %1534 = vmatpush.xpose.msk.msra.mxu1 %vm861_vm3, %v2110_v60  ;;  %1587 = vmatpush.xpose.msk.msrb.mxu0 %vm861_vm3, %v897_v52 }
 0x15e   : > { %1543 = vmatpush.xpose.msk.msra.mxu2 %vm861_vm3, %v894_v32 }
 0x15f   : > { %1552 = vmatpush.xpose.msk.msrb.mxu3 %vm861_vm3, %v2115_v33 }
 0x161   : > { %1535 = vmatpush.xpose.msk.msra.mxu1 %vm861_vm3, %v901_v35  ;;  %1588 = vmatpush.xpose.msk.msrb.mxu0 %vm861_vm3, %v896_v25 }
 0x162   : > { %1544 = vmatpush.xpose.msk.msra.mxu2 %vm861_vm3, %v893_v37 }
 0x163   : > { %1553 = vmatpush.xpose.msk.msrb.mxu3 %vm861_vm3, %v1003_v39 }
 0x165   : > { %1536 = vmatpush.xpose.msk.msra.mxu1 %vm861_vm3, %v900_v56  ;;  %1589 = vmatpush.xpose.msk.msrb.mxu0 %vm861_vm3, %v895_v28 }
 0x166   : > { %1545 = vmatpush.xpose.msk.msra.mxu2 %vm861_vm3, %v892_v38 }
 0x167   : > { %1554 = vmatpush.xpose.msk.msrb.mxu3 %vm861_vm3, %v1002_v57 }
 0x168   : > { %1537 = vmatmul.msk.f32.vlgmr.msra.gmra.mxu1 %vm861_vm3, %v253_v40 }
 0x169   : > { %1556 = vmatpush.xpose.msk.msrb.mxu1 %vm861_vm3, %v1233_v23  ;;  %1546 = vmatmul.msk.f32.vlgmr.msra.gmra.mxu2 %vm861_vm3, %v252_v54 }
 0x16a   : > { %1565 = vmatpush.xpose.msk.msrb.mxu2 %vm861_vm3, %v1121_v41  ;;  %1555 = vmatmul.msk.f32.vlgmr.msrb.gmra.mxu3 %vm861_vm3, %v254_v27 }
 0x16b   : > { %1574 = vmatpush.xpose.msk.msra.mxu3 %vm861_vm3, %v1177_v44  ;;  %1590 = vmatpush.xpose.msk.msrb.mxu0 %vm861_vm3, %v894_v32 }
 0x16d   : > { %1557 = vmatpush.xpose.msk.msrb.mxu1 %vm861_vm3, %v2055_v19 }
 0x16e   : > { %1566 = vmatpush.xpose.msk.msrb.mxu2 %vm861_vm3, %v2053_v58  ;;  %1591 = vmatmul.msk.f32.vlgmr.msrb.gmra.mxu0 %vm861_vm3, %v258_v0 }
 0x16f   : > { %1575 = vmatpush.xpose.msk.msra.mxu3 %vm861_vm3, %v2057_v20 }
 0x171   : > { %1558 = vmatpush.xpose.msk.msrb.mxu1 %vm861_vm3, %v2068_v16 }
 0x172   : > { %1567 = vmatpush.xpose.msk.msrb.mxu2 %vm861_vm3, %v2066_v24 }
 0x173   : > { %1576 = vmatpush.xpose.msk.msra.mxu3 %vm861_vm3, %v2074_v22 }
 0x175   : > { %1559 = vmatpush.xpose.msk.msrb.mxu1 %vm861_vm3, %v897_v52 }
 0x176   : > { %1568 = vmatpush.xpose.msk.msrb.mxu2 %vm861_vm3, %v2078_v34 }
 0x177   : > { %1577 = vmatpush.xpose.msk.msra.mxu3 %vm861_vm3, %v2083_v53 }
 0x179   : > { %1560 = vmatpush.xpose.msk.msrb.mxu1 %vm861_vm3, %v896_v25 }
 0x17a   : > { %1569 = vmatpush.xpose.msk.msrb.mxu2 %vm861_vm3, %v2088_v21 }
 0x17b   : > { %1578 = vmatpush.xpose.msk.msra.mxu3 %vm861_vm3, %v2093_v50 }
 0x17d   : > { %1561 = vmatpush.xpose.msk.msrb.mxu1 %vm861_vm3, %v895_v28 }
 0x17e   : > { %1570 = vmatpush.xpose.msk.msrb.mxu2 %vm861_vm3, %v2099_v26 }
 0x17f   : > { %1579 = vmatpush.xpose.msk.msra.mxu3 %vm861_vm3, %v2104_v31 }
 0x181   : > { %1562 = vmatpush.xpose.msk.msrb.mxu1 %vm861_vm3, %v894_v32 }
 0x182   : > { %1571 = vmatpush.xpose.msk.msrb.mxu2 %vm861_vm3, %v2110_v60 }
 0x183   : > { %1580 = vmatpush.xpose.msk.msra.mxu3 %vm861_vm3, %v2115_v33 }
 0x185   : > { %1563 = vmatpush.xpose.msk.msrb.mxu1 %vm861_vm3, %v893_v37 }
 0x186   : > { %1572 = vmatpush.xpose.msk.msrb.mxu2 %vm861_vm3, %v901_v35 }
 0x187   : > { %1581 = vmatpush.xpose.msk.msra.mxu3 %vm861_vm3, %v1003_v39 }
 0x188   : > { %1564 = vmatmul.msk.f32.vlgmr.msrb.gmra.mxu1 %vm861_vm3, %v255_v43 }
 0x189   : > { %1592 = vmatpush.xpose.msk.msra.mxu1 %vm861_vm3, %v1290_v45  ;;  %1573 = vmatmul.msk.f32.vlgmr.msrb.gmra.mxu2 %vm861_vm3, %v256_v51 }
 0x18a   : > { %1601 = vmatpush.xpose.msk.msra.mxu2 %vm861_vm3, %v1346_v47  ;;  %1582 = vmatmul.msk.f32.vlgmr.msra.gmra.mxu3 %vm861_vm3, %v257_v61 }
 0x18d   : > { %1593 = vmatpush.xpose.msk.msra.mxu1 %vm861_vm3, %v1121_v41 }
 0x18e   : > { %1602 = vmatpush.xpose.msk.msra.mxu2 %vm861_vm3, %v1177_v44 }
 0x191   : > { %1594 = vmatpush.xpose.msk.msra.mxu1 %vm861_vm3, %v2053_v58 }
 0x192   : > { %1603 = vmatpush.xpose.msk.msra.mxu2 %vm861_vm3, %v2057_v20 }
 0x195   : > { %1595 = vmatpush.xpose.msk.msra.mxu1 %vm861_vm3, %v2066_v24 }
 0x196   : > { %1604 = vmatpush.xpose.msk.msra.mxu2 %vm861_vm3, %v2074_v22 }
 0x199   : > { %1596 = vmatpush.xpose.msk.msra.mxu1 %vm861_vm3, %v2078_v34 }
 0x19a   : > { %1605 = vmatpush.xpose.msk.msra.mxu2 %vm861_vm3, %v2083_v53 }
 0x19d   : > { %1597 = vmatpush.xpose.msk.msra.mxu1 %vm861_vm3, %v2088_v21 }
 0x19e   : > { %1606 = vmatpush.xpose.msk.msra.mxu2 %vm861_vm3, %v2093_v50 }
 0x1a1   : > { %1598 = vmatpush.xpose.msk.msra.mxu1 %vm861_vm3, %v2099_v26 }
 0x1a2   : > { %1607 = vmatpush.xpose.msk.msra.mxu2 %vm861_vm3, %v2104_v31 }
 0x1a5   : > { %1599 = vmatpush.xpose.msk.msra.mxu1 %vm861_vm3, %v2110_v60 }
 0x1a6   : > { %1608 = vmatpush.xpose.msk.msra.mxu2 %vm861_vm3, %v2115_v33 }
 0x1a8   : > { %1600 = vmatmul.msk.f32.vlgmr.msra.gmra.mxu1 %vm861_vm3, %v259_v36 }
 0x1a9   : > { %1609 = vmatmul.msk.f32.vlgmr.msra.gmra.mxu2 %vm861_vm3, %v260_v1 }
 0x1e5   : > { %v952_v62 = vpop.f32.mrf.mxu1 }
 0x1eb   : > { %v1279_v10 = vpop.f32.mrf.mxu0 }
 0x1ec   : > { %v999_v2 = vpop.f32.mrf.mxu2 }
 0x1ed   : > { %v1000_v3 = vadd.f32 %v999_v2, %v952_v62  ;;  %v1054_v59 = vpop.f32.mrf.mxu3 }
 0x1ef   : > { %v1057_v42 = vadd.f32 %v1054_v59, %v1000_v3 }
 0x205   : > { %v1110_v4 = vpop.f32.mrf.mxu1 }
 0x206   : > { %v1113_v7 = vadd.f32 %v1110_v4, %v1057_v42 }
 0x20c   : > { %v1166_v55 = vpop.f32.mrf.mxu2 }
 0x20d   : > { %v1169_v6 = vadd.f32 %v1166_v55, %v1113_v7  ;;  %v1222_v8 = vpop.f32.mrf.mxu3 }
 0x20f   : > { %v1225_v9 = vadd.f32 %v1222_v8, %v1169_v6 }
 0x211   : > { %v1282_v30 = vadd.f32 %v1279_v10, %v1225_v9 }
 0x225   : > { %v1335_v11 = vpop.f32.mrf.mxu1 }
 0x226   : > { %v1338_v48 = vadd.f32 %v1335_v11, %v1282_v30 }
 0x22c   : > { %v1391_v49 = vpop.f32.mrf.mxu2 }
 0x22d   : > { %v1394_v12 = vadd.f32 %v1391_v49, %v1338_v48 }
 0x22f   : > { %1396 = vst.msk [vmem:[%s222_s21] sm:$0x3] %vm1395_vm5, %v1394_v12 }
 0x230 PF: > { %s15_s18 = sadd.s32 1, %s1633_s18  }
 0x231   : > { %p12_p4 = scmp.ge.s32.totalorder %s15_s18, 4  }
 0x233   :  { %14 = sbr.rel (!%p12_p4) target bundleno = 1 (0x1), region = 72 }

// kernel: point_flow_forward.5
= control target key start
LH: loop header
LB: loop body
LE: loop exit
PB: predicated region body
PF: predicated region fallthrough
CT: control target
= control target key end

     0   :  { %vm75_vm0 = vcmask 64512   ;;  %v398_v56 = vlaneseq  ;;  %s1929_s0 = inlined_call_operand.vmem [shape: f32[2,128,8], index: 0, kind: input, shape index: {}]   ;;  %s1930_s1 = inlined_call_operand.vmem [shape: f32[2,128,8], index: 1, kind: input, shape index: {}]   ;;  %s1931_s2 = inlined_call_operand.vmem [shape: f32[2,128,8], index: 2, kind: output, shape index: {}]  }
   0x1   :  { %v26_v0 = vld [vmem:[%s1929_s0 + $0x78] sm:$0xff]  ;;  %v25_v2 = vld [vmem:[%s1929_s0 + $0x70] sm:$0xff]  ;;  %v24_v4 = vld [vmem:[%s1929_s0 + $0x68] sm:$0xff] }
   0x2   :  { %v42_v1 = vld [vmem:[%s1929_s0 + $0xf8] sm:$0xff]  ;;  %887 = vmatpush.xpose.msk.msra.mxu0 %vm75_vm0, %v26_v0  ;;  %v41_v3 = vld [vmem:[%s1929_s0 + $0xf0] sm:$0xff]  ;;  %721 = vmatpush.msra.mxu2 %v26_v0  ;;  %v40_v5 = vld [vmem:[%s1929_s0 + $0xe8] sm:$0xff]  ;;  %v1377_v58 = vand.u32 127, %v398_v56 }
   0x3   :  { %919 = vmatpush.xpose.msk.msra.mxu1 %vm75_vm0, %v42_v1  ;;  %786 = vmatpush.msra.mxu3 %v42_v1  ;;  %v23_v6 = vld [vmem:[%s1929_s0 + $0x60] sm:$0xff]  ;;  %v22_v8 = vld [vmem:[%s1929_s0 + $0x58] sm:$0xff]  ;;  %v21_v10 = vld [vmem:[%s1929_s0 + $0x50] sm:$0xff] }
   0x4   :  { %722 = vmatpush.msra.mxu2 %v25_v2  ;;  %v39_v7 = vld [vmem:[%s1929_s0 + $0xe0] sm:$0xff]  ;;  %v38_v9 = vld [vmem:[%s1929_s0 + $0xd8] sm:$0xff]  ;;  %v37_v11 = vld [vmem:[%s1929_s0 + $0xd0] sm:$0xff]  ;;  %vm400_vm1 = vcmp.lt.s32.totalorder %v1377_v58, 8 }
   0x5   :  { %787 = vmatpush.msra.mxu3 %v41_v3  ;;  %v20_v12 = vld [vmem:[%s1929_s0 + $0x48] sm:$0xff]  ;;  %v19_v14 = vld [vmem:[%s1929_s0 + $0x40] sm:$0xff]  ;;  %v18_v16 = vld [vmem:[%s1929_s0 + $0x38] sm:$0xff] }
   0x6   :  { %888 = vmatpush.xpose.msk.msra.mxu0 %vm75_vm0, %v25_v2  ;;  %723 = vmatpush.msra.mxu2 %v24_v4  ;;  %v36_v13 = vld [vmem:[%s1929_s0 + $0xc8] sm:$0xff]  ;;  %v35_v15 = vld [vmem:[%s1929_s0 + $0xc0] sm:$0xff]  ;;  %v34_v17 = vld [vmem:[%s1929_s0 + $0xb8] sm:$0xff] }
   0x7   :  { %920 = vmatpush.xpose.msk.msra.mxu1 %vm75_vm0, %v41_v3  ;;  %788 = vmatpush.msra.mxu3 %v40_v5  ;;  %v17_v18 = vld [vmem:[%s1929_s0 + $0x30] sm:$0xff]  ;;  %v16_v20 = vld [vmem:[%s1929_s0 + $0x28] sm:$0xff]  ;;  %v15_v22 = vld [vmem:[%s1929_s0 + $0x20] sm:$0xff] }
   0x8   :  { %724 = vmatpush.msra.mxu2 %v23_v6  ;;  %v33_v19 = vld [vmem:[%s1929_s0 + $0xb0] sm:$0xff]  ;;  %v32_v21 = vld [vmem:[%s1929_s0 + $0xa8] sm:$0xff]  ;;  %v31_v23 = vld [vmem:[%s1929_s0 + $0xa0] sm:$0xff] }
   0x9   :  { %789 = vmatpush.msra.mxu3 %v39_v7  ;;  %v14_v24 = vld [vmem:[%s1929_s0 + $0x18] sm:$0xff]  ;;  %v13_v26 = vld [vmem:[%s1929_s0 + $0x10] sm:$0xff]  ;;  %v12_v28 = vld [vmem:[%s1929_s0 + $0x8] sm:$0xff] }
   0xa   :  { %889 = vmatpush.xpose.msk.msra.mxu0 %vm75_vm0, %v24_v4  ;;  %725 = vmatpush.msra.mxu2 %v22_v8  ;;  %v30_v25 = vld [vmem:[%s1929_s0 + $0x98] sm:$0xff]  ;;  %v29_v27 = vld [vmem:[%s1929_s0 + $0x90] sm:$0xff]  ;;  %v28_v29 = vld [vmem:[%s1929_s0 + $0x88] sm:$0xff] }
   0xb   :  { %921 = vmatpush.xpose.msk.msra.mxu1 %vm75_vm0, %v40_v5  ;;  %790 = vmatpush.msra.mxu3 %v38_v9  ;;  %v11_v30 = vld [vmem:[%s1929_s0] sm:$0xff]  ;;  %v1258_v34 = vld [vmem:[%s1930_s1 + $0x8] sm:$0xff]  ;;  %v1272_v36 = vld [vmem:[%s1930_s1 + $0x10] sm:$0xff] }
   0xc   :  { %726 = vmatpush.msra.mxu2 %v21_v10  ;;  %v27_v31 = vld [vmem:[%s1929_s0 + $0x80] sm:$0xff]  ;;  %v1263_v35 = vld [vmem:[%s1930_s1 + $0x88] sm:$0xff]  ;;  %v1277_v37 = vld [vmem:[%s1930_s1 + $0x90] sm:$0xff] }
   0xd   :  { %791 = vmatpush.msra.mxu3 %v37_v11  ;;  %v1244_v32 = vld [vmem:[%s1930_s1] sm:$0xff]  ;;  %v1286_v38 = vld [vmem:[%s1930_s1 + $0x18] sm:$0xff]  ;;  %v1314_v42 = vld [vmem:[%s1930_s1 + $0x28] sm:$0xff] }
   0xe   :  { %890 = vmatpush.xpose.msk.msra.mxu0 %vm75_vm0, %v23_v6  ;;  %727 = vmatpush.msra.mxu2 %v20_v12  ;;  %v1249_v33 = vld [vmem:[%s1930_s1 + $0x80] sm:$0xff]  ;;  %v1291_v39 = vld [vmem:[%s1930_s1 + $0x98] sm:$0xff]  ;;  %v1319_v43 = vld [vmem:[%s1930_s1 + $0xa8] sm:$0xff] }
   0xf   :  { %922 = vmatpush.xpose.msk.msra.mxu1 %vm75_vm0, %v39_v7  ;;  %792 = vmatpush.msra.mxu3 %v36_v13  ;;  %v1300_v40 = vld [vmem:[%s1930_s1 + $0x20] sm:$0xff]  ;;  %v49_v44 = vld [vmem:[%s1930_s1 + $0x30] sm:$0xff]  ;;  %v50_v46 = vld [vmem:[%s1930_s1 + $0x38] sm:$0xff] }
  0x10   :  { %728 = vmatpush.msra.mxu2 %v19_v14  ;;  %v1305_v41 = vld [vmem:[%s1930_s1 + $0xa0] sm:$0xff]  ;;  %v65_v45 = vld [vmem:[%s1930_s1 + $0xb0] sm:$0xff]  ;;  %v66_v47 = vld [vmem:[%s1930_s1 + $0xb8] sm:$0xff] }
  0x11   :  { %793 = vmatpush.msra.mxu3 %v35_v15  ;;  %v51_v48 = vld [vmem:[%s1930_s1 + $0x40] sm:$0xff]  ;;  %v52_v50 = vld [vmem:[%s1930_s1 + $0x48] sm:$0xff]  ;;  %v53_v52 = vld [vmem:[%s1930_s1 + $0x50] sm:$0xff] }
  0x12   :  { %891 = vmatpush.xpose.msk.msra.mxu0 %vm75_vm0, %v22_v8  ;;  %729 = vmatpush.msra.mxu2 %v18_v16  ;;  %v67_v49 = vld [vmem:[%s1930_s1 + $0xc0] sm:$0xff]  ;;  %v68_v51 = vld [vmem:[%s1930_s1 + $0xc8] sm:$0xff]  ;;  %v69_v53 = vld [vmem:[%s1930_s1 + $0xd0] sm:$0xff] }
  0x13   :  { %923 = vmatpush.xpose.msk.msra.mxu1 %vm75_vm0, %v38_v9  ;;  %794 = vmatpush.msra.mxu3 %v34_v17  ;;  %v70_v54 = vld [vmem:[%s1930_s1 + $0xd8] sm:$0xff]  ;;  %v55_v57 = vld [vmem:[%s1930_s1 + $0x60] sm:$0xff]  ;;  %v72_v2 = vld [vmem:[%s1930_s1 + $0xe8] sm:$0xff] }
  0x14   :  { %730 = vmatpush.msra.mxu2 %v17_v18  ;;  %v54_v55 = vld [vmem:[%s1930_s1 + $0x58] sm:$0xff]  ;;  %v71_v61 = vld [vmem:[%s1930_s1 + $0xe0] sm:$0xff]  ;;  %v73_v7 = vld [vmem:[%s1930_s1 + $0xf0] sm:$0xff] }
  0x15   :  { %795 = vmatpush.msra.mxu3 %v33_v19 }
  0x16   :  { %892 = vmatpush.xpose.msk.msra.mxu0 %vm75_vm0, %v21_v10  ;;  %731 = vmatpush.msra.mxu2 %v16_v20 }
  0x17   :  { %924 = vmatpush.xpose.msk.msra.mxu1 %vm75_vm0, %v37_v11  ;;  %796 = vmatpush.msra.mxu3 %v32_v21 }
  0x18   :  { %732 = vmatpush.msra.mxu2 %v15_v22 }
  0x19   :  { %797 = vmatpush.msra.mxu3 %v31_v23 }
  0x1a   :  { %893 = vmatpush.xpose.msk.msra.mxu0 %vm75_vm0, %v20_v12  ;;  %733 = vmatpush.msra.mxu2 %v14_v24  ;;  %v56_v12 = vld [vmem:[%s1930_s1 + $0x68] sm:$0xff] }
  0x1b   :  { %925 = vmatpush.xpose.msk.msra.mxu1 %vm75_vm0, %v36_v13  ;;  %798 = vmatpush.msra.mxu3 %v30_v25 }
  0x1c   :  { %734 = vmatpush.msra.mxu2 %v13_v26 }
  0x1d   :  { %799 = vmatpush.msra.mxu3 %v29_v27 }
  0x1e   :  { %894 = vmatpush.xpose.msk.msra.mxu0 %vm75_vm0, %v19_v14  ;;  %735 = vmatpush.msra.mxu2 %v12_v28 }
  0x1f   :  { %926 = vmatpush.xpose.msk.msra.mxu1 %vm75_vm0, %v35_v15  ;;  %800 = vmatpush.msra.mxu3 %v28_v29 }
  0x20   :  { %736 = vmatpush.msra.mxu2 %v11_v30 }
  0x21   :  { %801 = vmatpush.msra.mxu3 %v27_v31 }
  0x22   :  { %895 = vmatpush.xpose.msk.msra.mxu0 %vm75_vm0, %v18_v16 }
  0x23   :  { %927 = vmatpush.xpose.msk.msra.mxu1 %vm75_vm0, %v34_v17  ;;  %v57_v17 = vld [vmem:[%s1930_s1 + $0x70] sm:$0xff] }
  0x26   :  { %896 = vmatpush.xpose.msk.msra.mxu0 %vm75_vm0, %v17_v18 }
  0x27   :  { %928 = vmatpush.xpose.msk.msra.mxu1 %vm75_vm0, %v33_v19 }
  0x2a   :  { %897 = vmatpush.xpose.msk.msra.mxu0 %vm75_vm0, %v16_v20 }
  0x2b   :  { %929 = vmatpush.xpose.msk.msra.mxu1 %vm75_vm0, %v32_v21 }
  0x2e   :  { %898 = vmatpush.xpose.msk.msra.mxu0 %vm75_vm0, %v15_v22  ;;  %v58_v22 = vld [vmem:[%s1930_s1 + $0x78] sm:$0xff] }
  0x2f   :  { %930 = vmatpush.xpose.msk.msra.mxu1 %vm75_vm0, %v31_v23 }
  0x32   :  { %899 = vmatpush.xpose.msk.msra.mxu0 %vm75_vm0, %v14_v24 }
  0x33   :  { %931 = vmatpush.xpose.msk.msra.mxu1 %vm75_vm0, %v30_v25 }
  0x36   :  { %900 = vmatpush.xpose.msk.msra.mxu0 %vm75_vm0, %v13_v26 }
  0x37   :  { %932 = vmatpush.xpose.msk.msra.mxu1 %vm75_vm0, %v29_v27  ;;  %v1467_v27 = vld [vmem:[%s1930_s1 + $0xf8] sm:$0xff] }
  0x3a   :  { %901 = vmatpush.xpose.msk.msra.mxu0 %vm75_vm0, %v12_v28 }
  0x3b   :  { %933 = vmatpush.xpose.msk.msra.mxu1 %vm75_vm0, %v28_v29 }
  0x3e   :  { %902 = vmatpush.xpose.msk.msra.mxu0 %vm75_vm0, %v11_v30 }
  0x3f   :  { %934 = vmatpush.xpose.msk.msra.mxu1 %vm75_vm0, %v27_v31 }
  0x41   :  { %903 = vmatmul.msk.f32.vlgmr.msra.gmra.mxu0 %vm75_vm0, %v1244_v32 }
  0x42   :  { %935 = vmatmul.msk.f32.vlgmr.msra.gmra.mxu1 %vm75_vm0, %v1249_v33 }
  0x49   :  { %904 = vmatmul.msk.f32.gmra.mxu0 %vm75_vm0, %v1258_v34 }
  0x4a   :  { %936 = vmatmul.msk.f32.gmra.mxu1 %vm75_vm0, %v1263_v35 }
  0x51   :  { %905 = vmatmul.msk.f32.gmra.mxu0 %vm75_vm0, %v1272_v36 }
  0x52   :  { %937 = vmatmul.msk.f32.gmra.mxu1 %vm75_vm0, %v1277_v37 }
  0x59   :  { %906 = vmatmul.msk.f32.gmra.mxu0 %vm75_vm0, %v1286_v38 }
  0x5a   :  { %938 = vmatmul.msk.f32.gmra.mxu1 %vm75_vm0, %v1291_v39 }
  0x61   :  { %907 = vmatmul.msk.f32.gmra.mxu0 %vm75_vm0, %v1300_v40 }
  0x62   :  { %939 = vmatmul.msk.f32.gmra.mxu1 %vm75_vm0, %v1305_v41 }
  0x69   :  { %908 = vmatmul.msk.f32.gmra.mxu0 %vm75_vm0, %v1314_v42 }
  0x6a   :  { %940 = vmatmul.msk.f32.gmra.mxu1 %vm75_vm0, %v1319_v43 }
  0x71   :  { %909 = vmatmul.msk.f32.gmra.mxu0 %vm75_vm0, %v49_v44 }
  0x72   :  { %941 = vmatmul.msk.f32.gmra.mxu1 %vm75_vm0, %v65_v45 }
  0x79   :  { %910 = vmatmul.msk.f32.gmra.mxu0 %vm75_vm0, %v50_v46 }
  0x7a   :  { %942 = vmatmul.msk.f32.gmra.mxu1 %vm75_vm0, %v66_v47 }
  0x81   :  { %911 = vmatmul.msk.f32.gmra.mxu0 %vm75_vm0, %v51_v48 }
  0x82   :  { %943 = vmatmul.msk.f32.gmra.mxu1 %vm75_vm0, %v67_v49 }
  0x89   :  { %912 = vmatmul.msk.f32.gmra.mxu0 %vm75_vm0, %v52_v50 }
  0x8a   :  { %944 = vmatmul.msk.f32.gmra.mxu1 %vm75_vm0, %v68_v51 }
  0x91   :  { %913 = vmatmul.msk.f32.gmra.mxu0 %vm75_vm0, %v53_v52 }
  0x92   :  { %945 = vmatmul.msk.f32.gmra.mxu1 %vm75_vm0, %v69_v53 }
  0x99   :  { %914 = vmatmul.msk.f32.gmra.mxu0 %vm75_vm0, %v54_v55 }
  0x9a   :  { %946 = vmatmul.msk.f32.gmra.mxu1 %vm75_vm0, %v70_v54 }
  0xa1   :  { %915 = vmatmul.msk.f32.gmra.mxu0 %vm75_vm0, %v55_v57 }
  0xa2   :  { %947 = vmatmul.msk.f32.gmra.mxu1 %vm75_vm0, %v71_v61 }
  0xa9   :  { %916 = vmatmul.msk.f32.gmra.mxu0 %vm75_vm0, %v56_v12 }
  0xaa   :  { %948 = vmatmul.msk.f32.gmra.mxu1 %vm75_vm0, %v72_v2 }
  0xb1   :  { %917 = vmatmul.msk.f32.gmra.mxu0 %vm75_vm0, %v57_v17 }
  0xb2   :  { %949 = vmatmul.msk.f32.gmra.mxu1 %vm75_vm0, %v73_v7 }
  0xb9   :  { %918 = vmatmul.msk.f32.gmra.mxu0 %vm75_vm0, %v58_v22 }
  0xba   :  { %950 = vmatmul.msk.f32.gmra.mxu1 %vm75_vm0, %v1467_v27 }
  0xbe   :  { %v189_v59 = vpop.f32.mrf.mxu0 }
  0xbf   :  { %v350_v60 = vpop.f32.mrf.mxu1  ;;  %v1385_v62 = vsel %vm400_vm1, %v189_v59, -1e+30 }
  0xc0   :  { %433 = vmax.xlane.f32.xlu0 %v1385_v62  ;;  %v1391_v63 = vsel %vm400_vm1, %v350_v60, -1e+30 }
  0xc6   :  { %v192_v0 = vpop.f32.mrf.mxu0 }
  0xc7   :  { %v353_v1 = vpop.f32.mrf.mxu1  ;;  %v1398_v3 = vsel %vm400_vm1, %v192_v0, -1e+30 }
  0xc8   :  { %465 = vmax.xlane.f32.xlu0 %v1391_v63  ;;  %435 = vmax.xlane.f32.xlu1 %v1398_v3  ;;  %v1405_v4 = vsel %vm400_vm1, %v353_v1, -1e+30 }
  0xce   :  { %v195_v5 = vpop.f32.mrf.mxu0 }
  0xcf   :  { %v356_v6 = vpop.f32.mrf.mxu1  ;;  %v1412_v8 = vsel %vm400_vm1, %v195_v5, -1e+30 }
  0xd0   :  { %467 = vmax.xlane.f32.xlu1 %v1405_v4  ;;  %437 = vmax.xlane.f32.xlu2 %v1412_v8  ;;  %v1419_v9 = vsel %vm400_vm1, %v356_v6, -1e+30 }
  0xd6   :  { %v198_v10 = vpop.f32.mrf.mxu0 }
  0xd7   :  { %v359_v11 = vpop.f32.mrf.mxu1  ;;  %v1430_v14 = vsel %vm400_vm1, %v198_v10, -1e+30 }
  0xd8   :  { %v1426_v13 = vsel %vm400_vm1, %v359_v11, -1e+30  ;;  %469 = vmax.xlane.f32.xlu2 %v1419_v9  ;;  %439 = vmax.xlane.f32.xlu0 %v1430_v14 }
  0xd9   :  { %471 = vmax.xlane.f32.xlu1 %v1426_v13 }
  0xde   :  { %v201_v15 = vpop.f32.mrf.mxu0 }
  0xdf   :  { %v362_v16 = vpop.f32.mrf.mxu1  ;;  %v1445_v19 = vsel %vm400_vm1, %v201_v15, -1e+30 }
  0xe0   :  { %v1441_v18 = vsel %vm400_vm1, %v362_v16, -1e+30  ;;  %441 = vmax.xlane.f32.xlu2 %v1445_v19 }
  0xe1   :  { %473 = vmax.xlane.f32.xlu0 %v1441_v18 }
  0xe6   :  { %v204_v20 = vpop.f32.mrf.mxu0 }
  0xe7   :  { %v365_v21 = vpop.f32.mrf.mxu1  ;;  %v1459_v24 = vsel %vm400_vm1, %v204_v20, -1e+30 }
  0xe8   :  { %v1455_v23 = vsel %vm400_vm1, %v365_v21, -1e+30  ;;  %443 = vmax.xlane.f32.xlu1 %v1459_v24 }
  0xe9   :  { %475 = vmax.xlane.f32.xlu2 %v1455_v23 }
  0xee   :  { %v207_v25 = vpop.f32.mrf.mxu0 }
  0xef   :  { %v368_v26 = vpop.f32.mrf.mxu1  ;;  %v1475_v29 = vsel %vm400_vm1, %v207_v25, -1e+30 }
  0xf0   :  { %v1471_v28 = vsel %vm400_vm1, %v368_v26, -1e+30  ;;  %445 = vmax.xlane.f32.xlu0 %v1475_v29 }
  0xf1   :  { %477 = vmax.xlane.f32.xlu1 %v1471_v28 }
  0xf6   :  { %v210_v30 = vpop.f32.mrf.mxu0 }
  0xf7   :  { %v371_v31 = vpop.f32.mrf.mxu1  ;;  %v1487_v45 = vsel %vm400_vm1, %v210_v30, -1e+30 }
  0xf8   :  { %v1483_v44 = vsel %vm400_vm1, %v371_v31, -1e+30 }
  0xf9   :  { %479 = vmax.xlane.f32.xlu2 %v1483_v44  ;;  %447 = vmax.xlane.f32.xlu1 %v1487_v45 }
  0xfe   :  { %v213_v46 = vpop.f32.mrf.mxu0 }
  0xff   :  { %v374_v47 = vpop.f32.mrf.mxu1  ;;  %v1497_v49 = vsel %vm400_vm1, %v213_v46, -1e+30 }
 0x100   :  { %v1493_v48 = vsel %vm400_vm1, %v374_v47, -1e+30 }
 0x101   :  { %481 = vmax.xlane.f32.xlu0 %v1493_v48  ;;  %449 = vmax.xlane.f32.xlu2 %v1497_v49 }
 0x106   :  { %v216_v50 = vpop.f32.mrf.mxu0 }
 0x107   :  { %v377_v51 = vpop.f32.mrf.mxu1  ;;  %v1507_v53 = vsel %vm400_vm1, %v216_v50, -1e+30 }
 0x108   :  { %v1503_v52 = vsel %vm400_vm1, %v377_v51, -1e+30 }
 0x109   :  { %483 = vmax.xlane.f32.xlu1 %v1503_v52  ;;  %451 = vmax.xlane.f32.xlu0 %v1507_v53 }
 0x10e   :  { %v219_v54 = vpop.f32.mrf.mxu0 }
 0x10f   :  { %v380_v55 = vpop.f32.mrf.mxu1  ;;  %v1517_v57 = vsel %vm400_vm1, %v219_v54, -1e+30 }
 0x110   :  { %v1513_v56 = vsel %vm400_vm1, %v380_v55, -1e+30 }
 0x111   :  { %485 = vmax.xlane.f32.xlu2 %v1513_v56  ;;  %453 = vmax.xlane.f32.xlu1 %v1517_v57 }
 0x116   :  { %v222_v12 = vpop.f32.mrf.mxu0 }
 0x117   :  { %v383_v59 = vpop.f32.mrf.mxu1  ;;  %v1535_v20 = vsel %vm400_vm1, %v222_v12, -1e+30 }
 0x118   :  { %v1523_v60 = vsel %vm400_vm1, %v383_v59, -1e+30 }
 0x119   :  { %487 = vmax.xlane.f32.xlu0 %v1523_v60 }
 0x11e   :  { %v225_v51 = vpop.f32.mrf.mxu0 }
 0x11f   :  { %v1553_v55 = vsel %vm400_vm1, %v225_v51, -1e+30 }
 0x133   :  { %v434_v61 = vpop.xlane.xlu0 %433 }
 0x134   :  { %v497_v0 = vsub.f32 %v1385_v62, %v434_v61 }
 0x136   :  { %v529_v1 = vmul.f32 1.442695, %v497_v0  ;;  %v386_v0 = vpop.f32.mrf.mxu1 }
 0x138   :  { %951 = vpow2.f32 %v529_v1 }
 0x13b   :  { %v466_v2 = vpop.xlane.xlu0 %465  ;;  %v436_v5 = vpop.xlane.xlu1 %435 }
 0x13c   :  { %v513_v6 = vsub.f32 %v1391_v63, %v466_v2  ;;  %v498_v11 = vsub.f32 %v1398_v3, %v436_v5 }
 0x13e   :  { %v1528_v7 = vpop.eup %951  ;;  %v561_v10 = vmul.f32 1.442695, %v513_v6  ;;  %v531_v15 = vmul.f32 1.442695, %v498_v11  ;;  %v1566_v11 = vsel %vm400_vm1, %v386_v0, -1e+30 }
 0x13f   :  { %593 = vadd.xlane.f32.xlu2 %v1528_v7 }
 0x140   :  { %953 = vpow2.f32 %v561_v10 }
 0x141   :  { %955 = vpow2.f32 %v531_v15 }
 0x143   :  { %v468_v16 = vpop.xlane.xlu1 %467  ;;  %v438_v17 = vpop.xlane.xlu2 %437 }
 0x144   :  { %v514_v62 = vsub.f32 %v1405_v4, %v468_v16  ;;  %v499_v3 = vsub.f32 %v1412_v8, %v438_v17 }
 0x146   :  { %v1537_v21 = vpop.eup %953  ;;  %v563_v63 = vmul.f32 1.442695, %v514_v62  ;;  %v533_v25 = vmul.f32 1.442695, %v499_v3 }
 0x147   :  { %625 = vadd.xlane.f32.xlu0 %v1537_v21  ;;  %455 = vmax.xlane.f32.xlu2 %v1535_v20  ;;  %v1543_v30 = vpop.eup %955 }
 0x148   :  { %957 = vpow2.f32 %v563_v63 }
 0x149   :  { %959 = vpow2.f32 %v533_v25 }
 0x14b   :  { %v470_v22 = vpop.xlane.xlu2 %469  ;;  %v440_v4 = vpop.xlane.xlu0 %439 }
 0x14c   :  { %v515_v26 = vsub.f32 %v1419_v9, %v470_v22  ;;  %v472_v31 = vpop.xlane.xlu1 %471  ;;  %v500_v8 = vsub.f32 %v1430_v14, %v440_v4 }
 0x14d   :  { %v516_v50 = vsub.f32 %v1426_v13, %v472_v31 }
 0x14e   :  { %v1545_v46 = vpop.eup %957  ;;  %v565_v47 = vmul.f32 1.442695, %v515_v26  ;;  %v535_v59 = vmul.f32 1.442695, %v500_v8 }
 0x14f   :  { %595 = vadd.xlane.f32.xlu0 %v1543_v30  ;;  %627 = vadd.xlane.f32.xlu1 %v1545_v46  ;;  %v567_v54 = vmul.f32 1.442695, %v516_v50  ;;  %v1555_v1 = vpop.eup %959 }
 0x150   :  { %961 = vpow2.f32 %v565_v47 }
 0x151   :  { %963 = vpow2.f32 %v567_v54 }
 0x152   :  { %965 = vpow2.f32 %v535_v59 }
 0x153   :  { %v442_v9 = vpop.xlane.xlu2 %441 }
 0x154   :  { %v474_v61 = vpop.xlane.xlu0 %473  ;;  %v501_v5 = vsub.f32 %v1445_v19, %v442_v9  ;;  %v228_v9 = vpop.f32.mrf.mxu0 }
 0x155   :  { %v517_v13 = vsub.f32 %v1441_v18, %v474_v61  ;;  %v389_v18 = vpop.f32.mrf.mxu1 }
 0x156   :  { %v1557_v2 = vpop.eup %961  ;;  %v537_v14 = vmul.f32 1.442695, %v501_v5  ;;  %v1581_v25 = vsel %vm400_vm1, %v389_v18, -1e+30 }
 0x157   :  { %597 = vadd.xlane.f32.xlu1 %v1555_v1  ;;  %457 = vmax.xlane.f32.xlu0 %v1553_v55  ;;  %v569_v10 = vmul.f32 1.442695, %v517_v13  ;;  %v1568_v12 = vpop.eup %963 }
 0x158   :  { %629 = vadd.xlane.f32.xlu2 %v1557_v2  ;;  %v1570_v15 = vpop.eup %965  ;;  %967 = vpow2.f32 %v537_v14  ;;  %v1605_v14 = vsel %vm400_vm1, %v228_v9, -1e+30 }
 0x159   :  { %969 = vpow2.f32 %v569_v10 }
 0x15b   :  { %v444_v6 = vpop.xlane.xlu1 %443 }
 0x15c   :  { %v476_v19 = vpop.xlane.xlu2 %475  ;;  %v502_v16 = vsub.f32 %v1459_v24, %v444_v6 }
 0x15d   :  { %v518_v17 = vsub.f32 %v1455_v23, %v476_v19  ;;  %v392_v31 = vpop.f32.mrf.mxu1 }
 0x15e   :  { %v539_v63 = vmul.f32 1.442695, %v502_v16  ;;  %v1577_v3 = vpop.eup %967  ;;  %v1592_v8 = vsel %vm400_vm1, %v392_v31, -1e+30 }
 0x15f   :  { %489 = vmax.xlane.f32.xlu1 %v1566_v11  ;;  %631 = vadd.xlane.f32.xlu0 %v1568_v12  ;;  %v571_v22 = vmul.f32 1.442695, %v518_v17  ;;  %v1583_v26 = vpop.eup %969 }
 0x160   :  { %599 = vadd.xlane.f32.xlu2 %v1570_v15  ;;  %971 = vpow2.f32 %v539_v63 }
 0x161   :  { %973 = vpow2.f32 %v571_v22 }
 0x163   :  { %v446_v4 = vpop.xlane.xlu0 %445 }
 0x164   :  { %v478_v62 = vpop.xlane.xlu1 %477  ;;  %v503_v23 = vsub.f32 %v1475_v29, %v446_v4 }
 0x165   :  { %v519_v24 = vsub.f32 %v1471_v28, %v478_v62 }
 0x166   :  { %v541_v51 = vmul.f32 1.442695, %v503_v23  ;;  %v1594_v59 = vpop.eup %971 }
 0x167   :  { %633 = vadd.xlane.f32.xlu1 %v1583_v26  ;;  %601 = vadd.xlane.f32.xlu0 %v1577_v3  ;;  %v573_v50 = vmul.f32 1.442695, %v519_v24  ;;  %v1596_v61 = vpop.eup %973 }
 0x168   :  { %491 = vmax.xlane.f32.xlu2 %v1581_v25 }
 0x169   :  { %975 = vpow2.f32 %v573_v50 }
 0x16a   :  { %977 = vpow2.f32 %v541_v51 }
 0x16c   :  { %v480_v47 = vpop.xlane.xlu2 %479  ;;  %v448_v54 = vpop.xlane.xlu1 %447 }
 0x16d   :  { %v520_v28 = vsub.f32 %v1483_v44, %v480_v47  ;;  %v504_v29 = vsub.f32 %v1487_v45, %v448_v54  ;;  %v231_v45 = vpop.f32.mrf.mxu0 }
 0x16e   :  { %v1620_v22 = vsel %vm400_vm1, %v231_v45, -1e+30 }
 0x16f   :  { %603 = vadd.xlane.f32.xlu1 %v1594_v59  ;;  %493 = vmax.xlane.f32.xlu0 %v1592_v8  ;;  %v575_v0 = vmul.f32 1.442695, %v520_v28  ;;  %v543_v5 = vmul.f32 1.442695, %v504_v29  ;;  %v1607_v10 = vpop.eup %975  ;;  %v395_v29 = vpop.f32.mrf.mxu1 }
 0x170   :  { %635 = vadd.xlane.f32.xlu2 %v1596_v61  ;;  %v1609_v44 = vpop.eup %977 }
 0x171   :  { %979 = vpow2.f32 %v575_v0 }
 0x172   :  { %981 = vpow2.f32 %v543_v5  ;;  %v1644_v5 = vsel %vm400_vm1, %v395_v29, -1e+30 }
 0x174   :  { %v482_v13 = vpop.xlane.xlu0 %481  ;;  %v450_v6 = vpop.xlane.xlu2 %449 }
 0x175   :  { %v505_v19 = vsub.f32 %v1497_v49, %v450_v6  ;;  %v521_v18 = vsub.f32 %v1493_v48, %v482_v13  ;;  %v234_v23 = vpop.f32.mrf.mxu0 }
 0x176   :  { %v1631_v47 = vsel %vm400_vm1, %v234_v23, -1e+30 }
 0x177   :  { %637 = vadd.xlane.f32.xlu0 %v1607_v10  ;;  %459 = vmax.xlane.f32.xlu1 %v1605_v14  ;;  %v545_v17 = vmul.f32 1.442695, %v505_v19  ;;  %v1616_v62 = vpop.eup %979  ;;  %v577_v63 = vmul.f32 1.442695, %v521_v18 }
 0x178   :  { %605 = vadd.xlane.f32.xlu2 %v1609_v44  ;;  %v1622_v4 = vpop.eup %981 }
 0x179   :  { %983 = vpow2.f32 %v545_v17 }
 0x17a   :  { %985 = vpow2.f32 %v577_v63 }
 0x17c   :  { %v484_v16 = vpop.xlane.xlu1 %483  ;;  %v452_v24 = vpop.xlane.xlu0 %451 }
 0x17d   :  { %v522_v49 = vsub.f32 %v1503_v52, %v484_v16  ;;  %v506_v48 = vsub.f32 %v1507_v53, %v452_v24 }
 0x17f   :  { %607 = vadd.xlane.f32.xlu0 %v1622_v4  ;;  %639 = vadd.xlane.f32.xlu1 %v1616_v62  ;;  %v579_v31 = vmul.f32 1.442695, %v522_v49  ;;  %v547_v50 = vmul.f32 1.442695, %v506_v48  ;;  %v1633_v54 = vpop.eup %983 }
 0x180   :  { %461 = vmax.xlane.f32.xlu2 %v1620_v22  ;;  %v1635_v28 = vpop.eup %985 }
 0x181   :  { %987 = vpow2.f32 %v579_v31 }
 0x182   :  { %989 = vpow2.f32 %v547_v50 }
 0x184   :  { %v454_v51 = vpop.xlane.xlu1 %453  ;;  %v486_v9 = vpop.xlane.xlu2 %485 }
 0x185   :  { %v507_v52 = vsub.f32 %v1517_v57, %v454_v51  ;;  %v523_v53 = vsub.f32 %v1513_v56, %v486_v9 }
 0x187   :  { %609 = vadd.xlane.f32.xlu1 %v1633_v54  ;;  %463 = vmax.xlane.f32.xlu0 %v1631_v47  ;;  %v549_v0 = vmul.f32 1.442695, %v507_v52  ;;  %v581_v13 = vmul.f32 1.442695, %v523_v53  ;;  %v1646_v45 = vpop.eup %987 }
 0x188   :  { %641 = vadd.xlane.f32.xlu2 %v1635_v28  ;;  %v1648_v19 = vpop.eup %989 }
 0x189   :  { %991 = vpow2.f32 %v549_v0 }
 0x18a   :  { %993 = vpow2.f32 %v581_v13 }
 0x18c   :  { %v488_v6 = vpop.xlane.xlu0 %487 }
 0x18d   :  { %v524_v57 = vsub.f32 %v1523_v60, %v488_v6 }
 0x18f   :  { %495 = vmax.xlane.f32.xlu1 %v1644_v5  ;;  %643 = vadd.xlane.f32.xlu0 %v1646_v45  ;;  %v583_v56 = vmul.f32 1.442695, %v524_v57  ;;  %v1654_v58 = vpop.eup %991 }
 0x190   :  { %611 = vadd.xlane.f32.xlu2 %v1648_v19  ;;  %v1656_v18 = vpop.eup %993 }
 0x191   :  { %995 = vpow2.f32 %v583_v56 }
 0x197   :  { %613 = vadd.xlane.f32.xlu1 %v1654_v58  ;;  %v1660_v16 = vpop.eup %995 }
 0x198   :  { %645 = vadd.xlane.f32.xlu2 %v1656_v18 }
 0x19f   :  { %647 = vadd.xlane.f32.xlu1 %v1660_v16 }
 0x1b2   :  { %v594_v17 = vpop.xlane.xlu2 %593 }
 0x1b3   :  { %997 = vrcp.f32 %v594_v17 }
 0x1b9   :  { %v998_v60 = vpop.eup %997 }
 0x1ba   :  { %v626_v63 = vpop.xlane.xlu0 %625  ;;  %v456_v24 = vpop.xlane.xlu2 %455  ;;  %v689_v49 = vmul.f32 %v998_v60, %v1528_v7 }
 0x1bb   :  { %999 = vrcp.f32 %v626_v63  ;;  %v508_v48 = vsub.f32 %v1535_v20, %v456_v24 }
 0x1bc   :  { %737 = vmatmul.f32.vlgmr.msra.gmra.mxu2 %v689_v49 }
 0x1bd   :  { %v551_v23 = vmul.f32 1.442695, %v508_v48 }
 0x1bf   :  { %1001 = vpow2.f32 %v551_v23 }
 0x1c1   :  { %v1000_v31 = vpop.eup %999 }
 0x1c2   :  { %v596_v50 = vpop.xlane.xlu0 %595  ;;  %v628_v51 = vpop.xlane.xlu1 %627  ;;  %v705_v9 = vmul.f32 %v1000_v31, %v1537_v21 }
 0x1c3   :  { %1003 = vrcp.f32 %v596_v50 }
 0x1c4   :  { %1005 = vrcp.f32 %v628_v51  ;;  %802 = vmatmul.f32.vlgmr.msra.gmra.mxu3 %v705_v9 }
 0x1c5   :  { %v1666_v52 = vpop.eup %1001 }
 0x1c6   :  { %615 = vadd.xlane.f32.xlu0 %v1666_v52 }
 0x1c9   :  { %v1004_v53 = vpop.eup %1003 }
 0x1ca   :  { %v1006_v7 = vpop.eup %1005  ;;  %v598_v29 = vpop.xlane.xlu1 %597  ;;  %v690_v20 = vmul.f32 %v1004_v53, %v1543_v30 }
 0x1cb   :  { %v458_v0 = vpop.xlane.xlu0 %457  ;;  %1007 = vrcp.f32 %v598_v29  ;;  %v630_v13 = vpop.xlane.xlu2 %629  ;;  %v706_v57 = vmul.f32 %v1006_v7, %v1545_v46 }
 0x1cc   :  { %v509_v6 = vsub.f32 %v1553_v55, %v458_v0  ;;  %1009 = vrcp.f32 %v630_v13  ;;  %740 = vmatmul.f32.gmra.mxu2 %v690_v20 }
 0x1cd   :  { %805 = vmatmul.f32.gmra.mxu3 %v706_v57 }
 0x1ce   :  { %v553_v21 = vmul.f32 1.442695, %v509_v6 }
 0x1d0   :  { %1011 = vpow2.f32 %v553_v21 }
 0x1d1   :  { %v1008_v56 = vpop.eup %1007 }
 0x1d2   :  { %v1010_v17 = vpop.eup %1009  ;;  %v490_v60 = vpop.xlane.xlu1 %489  ;;  %v691_v24 = vmul.f32 %v1008_v56, %v1555_v1 }
 0x1d3   :  { %v632_v63 = vpop.xlane.xlu0 %631  ;;  %v525_v49 = vsub.f32 %v1566_v11, %v490_v60  ;;  %v600_v30 = vpop.xlane.xlu2 %599  ;;  %v707_v48 = vmul.f32 %v1010_v17, %v1557_v2 }
 0x1d4   :  { %1013 = vrcp.f32 %v632_v63  ;;  %743 = vmatmul.f32.gmra.mxu2 %v691_v24 }
 0x1d5   :  { %1015 = vrcp.f32 %v600_v30  ;;  %v585_v55 = vmul.f32 1.442695, %v525_v49  ;;  %808 = vmatmul.f32.gmra.mxu3 %v707_v48 }
 0x1d6   :  { %v1675_v46 = vpop.eup %1011 }
 0x1d7   :  { %617 = vadd.xlane.f32.xlu2 %v1675_v46  ;;  %1017 = vpow2.f32 %v585_v55 }
 0x1da   :  { %v1014_v23 = vpop.eup %1013  ;;  %v634_v50 = vpop.xlane.xlu1 %633 }
 0x1db   :  { %v1016_v31 = vpop.eup %1015  ;;  %v602_v51 = vpop.xlane.xlu0 %601  ;;  %v708_v1 = vmul.f32 %v1014_v23, %v1568_v12  ;;  %1019 = vrcp.f32 %v634_v50 }
 0x1dc   :  { %v492_v11 = vpop.xlane.xlu2 %491  ;;  %v692_v9 = vmul.f32 %v1016_v31, %v1570_v15  ;;  %1021 = vrcp.f32 %v602_v51 }
 0x1dd   :  { %v526_v2 = vsub.f32 %v1581_v25, %v492_v11  ;;  %v1681_v53 = vpop.eup %1017  ;;  %811 = vmatmul.f32.gmra.mxu3 %v708_v1 }
 0x1de   :  { %746 = vmatmul.f32.gmra.mxu2 %v692_v9  ;;  %649 = vadd.xlane.f32.xlu0 %v1681_v53 }
 0x1df   :  { %v587_v7 = vmul.f32 1.442695, %v526_v2 }
 0x1e1   :  { %1023 = vpow2.f32 %v587_v7  ;;  %v1020_v29 = vpop.eup %1019 }
 0x1e2   :  { %v1022_v0 = vpop.eup %1021  ;;  %v604_v20 = vpop.xlane.xlu1 %603  ;;  %v709_v12 = vmul.f32 %v1020_v29, %v1583_v26 }
 0x1e3   :  { %v494_v13 = vpop.xlane.xlu0 %493  ;;  %1025 = vrcp.f32 %v604_v20  ;;  %v693_v15 = vmul.f32 %v1022_v0, %v1577_v3 }
 0x1e4   :  { %v636_v6 = vpop.xlane.xlu2 %635  ;;  %v527_v49 = vsub.f32 %v1592_v8, %v494_v13 }
 0x1e5   :  { %1027 = vrcp.f32 %v636_v6  ;;  %814 = vmatmul.f32.gmra.mxu3 %v709_v12 }
 0x1e6   :  { %749 = vmatmul.f32.gmra.mxu2 %v693_v15 }
 0x1e7   :  { %v1686_v25 = vpop.eup %1023 }
 0x1e8   :  { %651 = vadd.xlane.f32.xlu2 %v1686_v25 }
 0x1e9   :  { %v1026_v57 = vpop.eup %1025 }
 0x1ea   :  { %v460_v17 = vpop.xlane.xlu1 %459  ;;  %v694_v60 = vmul.f32 %v1026_v57, %v1594_v59  ;;  %v589_v59 = vmul.f32 1.442695, %v527_v49 }
 0x1eb   :  { %v1028_v21 = vpop.eup %1027  ;;  %v638_v56 = vpop.xlane.xlu0 %637  ;;  %v510_v26 = vsub.f32 %v1605_v14, %v460_v17 }
 0x1ec   :  { %v606_v63 = vpop.xlane.xlu2 %605  ;;  %1029 = vrcp.f32 %v638_v56  ;;  %v710_v24 = vmul.f32 %v1028_v21, %v1596_v61 }
 0x1ed   :  { %1031 = vrcp.f32 %v606_v63  ;;  %v555_v3 = vmul.f32 1.442695, %v510_v26 }
 0x1ee   :  { %752 = vmatmul.f32.gmra.mxu2 %v694_v60  ;;  %817 = vmatmul.f32.gmra.mxu3 %v710_v24 }
 0x1ef   :  { %1033 = vpow2.f32 %v555_v3 }
 0x1f2   :  { %v1030_v30 = vpop.eup %1029  ;;  %v640_v23 = vpop.xlane.xlu1 %639 }
 0x1f3   :  { %v1032_v48 = vpop.eup %1031  ;;  %v608_v55 = vpop.xlane.xlu0 %607  ;;  %v711_v31 = vmul.f32 %v1030_v30, %v1607_v10 }
 0x1f4   :  { %1035 = vrcp.f32 %v608_v55  ;;  %v462_v50 = vpop.xlane.xlu2 %461  ;;  %v695_v14 = vmul.f32 %v1032_v48, %v1609_v44 }
 0x1f5   :  { %1037 = vrcp.f32 %v640_v23  ;;  %v511_v61 = vsub.f32 %v1620_v22, %v462_v50  ;;  %v1696_v51 = vpop.eup %1033 }
 0x1f6   :  { %755 = vmatmul.f32.gmra.mxu2 %v695_v14  ;;  %820 = vmatmul.f32.gmra.mxu3 %v711_v31  ;;  %1039 = vpow2.f32 %v589_v59 }
 0x1f7   :  { %v557_v8 = vmul.f32 1.442695, %v511_v61  ;;  %619 = vadd.xlane.f32.xlu1 %v1696_v51 }
 0x1f9   :  { %1041 = vpow2.f32 %v557_v8 }
 0x1fa   :  { %v1036_v1 = vpop.eup %1035  ;;  %v610_v10 = vpop.xlane.xlu1 %609 }
 0x1fb   :  { %v1038_v11 = vpop.eup %1037  ;;  %v464_v9 = vpop.xlane.xlu0 %463  ;;  %v696_v2 = vmul.f32 %v1036_v1, %v1622_v4  ;;  %1043 = vrcp.f32 %v610_v10 }
 0x1fc   :  { %v642_v44 = vpop.xlane.xlu2 %641  ;;  %v512_v7 = vsub.f32 %v1631_v47, %v464_v9  ;;  %v712_v22 = vmul.f32 %v1038_v11, %v1616_v62  ;;  %v1702_v29 = vpop.eup %1039 }
 0x1fd   :  { %1045 = vrcp.f32 %v642_v44 }
 0x1fe   :  { %v559_v0 = vmul.f32 1.442695, %v512_v7  ;;  %758 = vmatmul.f32.gmra.mxu2 %v696_v2  ;;  %823 = vmatmul.f32.gmra.mxu3 %v712_v22 }
 0x1ff   :  { %v1704_v20 = vpop.eup %1041  ;;  %653 = vadd.xlane.f32.xlu1 %v1702_v29 }
 0x200   :  { %1047 = vpow2.f32 %v559_v0  ;;  %621 = vadd.xlane.f32.xlu0 %v1704_v20 }
 0x201   :  { %v1044_v4 = vpop.eup %1043 }
 0x202   :  { %v496_v12 = vpop.xlane.xlu1 %495  ;;  %v697_v47 = vmul.f32 %v1044_v4, %v1633_v54 }
 0x203   :  { %v1046_v13 = vpop.eup %1045  ;;  %v644_v6 = vpop.xlane.xlu0 %643  ;;  %v528_v62 = vsub.f32 %v1644_v5, %v496_v12 }
 0x204   :  { %v612_v15 = vpop.xlane.xlu2 %611  ;;  %1049 = vrcp.f32 %v644_v6  ;;  %v713_v57 = vmul.f32 %v1046_v13, %v1635_v28 }
 0x205   :  { %1051 = vrcp.f32 %v612_v15  ;;  %v591_v56 = vmul.f32 1.442695, %v528_v62 }
 0x206   :  { %v1711_v21 = vpop.eup %1047  ;;  %761 = vmatmul.f32.gmra.mxu2 %v697_v47  ;;  %826 = vmatmul.f32.gmra.mxu3 %v713_v57 }
 0x207   :  { %623 = vadd.xlane.f32.xlu2 %v1711_v21  ;;  %1053 = vpow2.f32 %v591_v56 }
 0x20a   :  { %v1050_v17 = vpop.eup %1049  ;;  %v614_v63 = vpop.xlane.xlu1 %613 }
 0x20b   :  { %v1052_v60 = vpop.eup %1051  ;;  %v714_v54 = vmul.f32 %v1050_v17, %v1646_v45  ;;  %1055 = vrcp.f32 %v614_v63 }
 0x20c   :  { %v646_v5 = vpop.xlane.xlu2 %645  ;;  %v698_v26 = vmul.f32 %v1052_v60, %v1648_v19  ;;  %v1080_v60 = vld [vmem:[%s1930_s1 + $0xb0] sm:$0xff] }
 0x20d   :  { %1057 = vrcp.f32 %v646_v5  ;;  %v1716_v28 = vpop.eup %1053 }
 0x20e   :  { %764 = vmatmul.f32.gmra.mxu2 %v698_v26  ;;  %829 = vmatmul.f32.gmra.mxu3 %v714_v54 }
 0x20f   :  { %655 = vadd.xlane.f32.xlu0 %v1716_v28 }
 0x211   :  { %v1056_v24 = vpop.eup %1055 }
 0x212   :  { %v648_v49 = vpop.xlane.xlu1 %647  ;;  %v699_v30 = vmul.f32 %v1056_v24, %v1654_v58 }
 0x213   :  { %v1058_v3 = vpop.eup %1057  ;;  %1059 = vrcp.f32 %v648_v49 }
 0x214   :  { %v715_v48 = vmul.f32 %v1058_v3, %v1656_v18 }
 0x216   :  { %767 = vmatmul.f32.gmra.mxu2 %v699_v30  ;;  %832 = vmatmul.f32.gmra.mxu3 %v715_v48  ;;  %v1082_v30 = vld [vmem:[%s1930_s1 + $0xb8] sm:$0xff] }
 0x219   :  { %v1060_v45 = vpop.eup %1059 }
 0x21a   :  { %v716_v19 = vmul.f32 %v1060_v45, %v1660_v16 }
 0x21e   :  { %835 = vmatmul.f32.gmra.mxu3 %v716_v19 }
 0x239   :  { %v616_v55 = vpop.xlane.xlu0 %615 }
 0x23a   :  { %1061 = vrcp.f32 %v616_v55 }
 0x23f   :  { %v738_v23 = vpop.f32.mrf.mxu2 }
 0x240   :  { %v1062_v31 = vpop.eup %1061  ;;  %v739_v59 = vadd.f32 %v738_v23, %v1244_v32 }
 0x241   :  { %v700_v50 = vmul.f32 %v1062_v31, %v1666_v52 }
 0x242   :  { %851 = vst.msk [vmem:[%s1931_s2] sm:$0xff] %vm75_vm0, %v739_v59  ;;  %v1083_v59 = vld [vmem:[%s1930_s1 + $0x40] sm:$0xff] }
 0x243   :  { %770 = vmatmul.f32.gmra.mxu2 %v700_v50  ;;  %v1084_v50 = vld [vmem:[%s1930_s1 + $0xc0] sm:$0xff] }
 0x247   :  { %v803_v58 = vpop.f32.mrf.mxu3 }
 0x248   :  { %v804_v18 = vadd.f32 %v803_v58, %v1249_v33 }
 0x24a   :  { %v618_v14 = vpop.xlane.xlu2 %617  ;;  %867 = vst.msk [vmem:[%s1931_s2 + $0x80] sm:$0xff] %vm75_vm0, %v804_v18 }
 0x24b   :  { %1063 = vrcp.f32 %v618_v14 }
 0x24f   :  { %v741_v16 = vpop.f32.mrf.mxu2 }
 0x250   :  { %v742_v52 = vadd.f32 %v741_v16, %v1258_v34  ;;  %v806_v61 = vpop.f32.mrf.mxu3 }
 0x251   :  { %v1064_v32 = vpop.eup %1063  ;;  %v807_v8 = vadd.f32 %v806_v61, %v1263_v35  ;;  %v650_v1 = vpop.xlane.xlu0 %649 }
 0x252   :  { %v701_v11 = vmul.f32 %v1064_v32, %v1675_v46  ;;  %852 = vst.msk [vmem:[%s1931_s2 + $0x8] sm:$0xff] %vm75_vm0, %v742_v52  ;;  %1065 = vrcp.f32 %v650_v1  ;;  %v1085_v32 = vld [vmem:[%s1930_s1 + $0x48] sm:$0xff] }
 0x253   :  { %868 = vst.msk [vmem:[%s1931_s2 + $0x88] sm:$0xff] %vm75_vm0, %v807_v8 }
 0x254   :  { %773 = vmatmul.f32.gmra.mxu2 %v701_v11  ;;  %v1087_v11 = vld [vmem:[%s1930_s1 + $0x50] sm:$0xff] }
 0x257   :  { %v744_v33 = vpop.f32.mrf.mxu2 }
 0x258   :  { %v1066_v34 = vpop.eup %1065  ;;  %v745_v10 = vadd.f32 %v744_v33, %v1272_v36  ;;  %v809_v35 = vpop.f32.mrf.mxu3 }
 0x259   :  { %v810_v9 = vadd.f32 %v809_v35, %v1277_v37  ;;  %v717_v46 = vmul.f32 %v1066_v34, %v1681_v53  ;;  %v1088_v34 = vld [vmem:[%s1930_s1 + $0xd0] sm:$0xff] }
 0x25a   :  { %853 = vst.msk [vmem:[%s1931_s2 + $0x10] sm:$0xff] %vm75_vm0, %v745_v10 }
 0x25b   :  { %v652_v2 = vpop.xlane.xlu2 %651  ;;  %869 = vst.msk [vmem:[%s1931_s2 + $0x90] sm:$0xff] %vm75_vm0, %v810_v9  ;;  %838 = vmatmul.f32.gmra.mxu3 %v717_v46  ;;  %v1089_v9 = vld [vmem:[%s1930_s1 + $0xd8] sm:$0xff] }
 0x25c   :  { %1067 = vrcp.f32 %v652_v2 }
 0x260   :  { %v812_v36 = vpop.f32.mrf.mxu3 }
 0x261   :  { %v747_v44 = vpop.f32.mrf.mxu2  ;;  %v813_v53 = vadd.f32 %v812_v36, %v1291_v39 }
 0x262   :  { %v1068_v7 = vpop.eup %1067  ;;  %v748_v37 = vadd.f32 %v747_v44, %v1286_v38  ;;  %v1090_v44 = vld [vmem:[%s1930_s1 + $0x58] sm:$0xff] }
 0x263   :  { %v718_v22 = vmul.f32 %v1068_v7, %v1686_v25  ;;  %870 = vst.msk [vmem:[%s1931_s2 + $0x98] sm:$0xff] %vm75_vm0, %v813_v53 }
 0x264   :  { %854 = vst.msk [vmem:[%s1931_s2 + $0x18] sm:$0xff] %vm75_vm0, %v748_v37  ;;  %v1091_v37 = vld [vmem:[%s1930_s1 + $0x60] sm:$0xff] }
 0x265   :  { %841 = vmatmul.f32.gmra.mxu3 %v718_v22 }
 0x268   :  { %v815_v4 = vpop.f32.mrf.mxu3 }
 0x269   :  { %v750_v0 = vpop.f32.mrf.mxu2  ;;  %v816_v38 = vadd.f32 %v815_v4, %v1305_v41 }
 0x26a   :  { %v751_v13 = vadd.f32 %v750_v0, %v1300_v40  ;;  %v620_v39 = vpop.xlane.xlu1 %619  ;;  %v1092_v0 = vld [vmem:[%s1930_s1 + $0xe0] sm:$0xff] }
 0x26b   :  { %1069 = vrcp.f32 %v620_v39  ;;  %871 = vst.msk [vmem:[%s1931_s2 + $0xa0] sm:$0xff] %vm75_vm0, %v816_v38  ;;  %v1093_v38 = vld [vmem:[%s1930_s1 + $0xe8] sm:$0xff] }
 0x26c   :  { %855 = vst.msk [vmem:[%s1931_s2 + $0x20] sm:$0xff] %vm75_vm0, %v751_v13 }
 0x271   :  { %v1070_v25 = vpop.eup %1069  ;;  %v753_v12 = vpop.f32.mrf.mxu2 }
 0x272   :  { %v818_v6 = vpop.f32.mrf.mxu3  ;;  %v754_v47 = vadd.f32 %v753_v12, %v1314_v42  ;;  %v654_v41 = vpop.xlane.xlu1 %653  ;;  %v702_v62 = vmul.f32 %v1070_v25, %v1696_v51  ;;  %v1079_v51 = vld [vmem:[%s1930_s1 + $0x30] sm:$0xff]  ;;  %v1094_v12 = vld [vmem:[%s1930_s1 + $0x68] sm:$0xff] }
 0x273   :  { %v819_v40 = vadd.f32 %v818_v6, %v1319_v43  ;;  %1071 = vrcp.f32 %v654_v41  ;;  %v622_v15 = vpop.xlane.xlu0 %621  ;;  %v1095_v41 = vld [vmem:[%s1930_s1 + $0xf0] sm:$0xff] }
 0x274   :  { %856 = vst.msk [vmem:[%s1931_s2 + $0x28] sm:$0xff] %vm75_vm0, %v754_v47  ;;  %1073 = vrcp.f32 %v622_v15  ;;  %776 = vmatmul.f32.gmra.mxu2 %v702_v62  ;;  %v1096_v15 = vld [vmem:[%s1930_s1 + $0x70] sm:$0xff] }
 0x275   :  { %872 = vst.msk [vmem:[%s1931_s2 + $0xa8] sm:$0xff] %vm75_vm0, %v819_v40 }
 0x279   :  { %v1072_v42 = vpop.eup %1071  ;;  %v756_v57 = vpop.f32.mrf.mxu2 }
 0x27a   :  { %v821_v43 = vpop.f32.mrf.mxu3  ;;  %v1074_v56 = vpop.eup %1073  ;;  %v757_v17 = vadd.f32 %v1079_v51, %v756_v57  ;;  %v719_v5 = vmul.f32 %v1072_v42, %v1702_v29  ;;  %v1081_v29 = vld [vmem:[%s1930_s1 + $0x38] sm:$0xff] }
 0x27b   :  { %v822_v63 = vadd.f32 %v1080_v60, %v821_v43  ;;  %v624_v54 = vpop.xlane.xlu2 %623  ;;  %v703_v26 = vmul.f32 %v1074_v56, %v1704_v20  ;;  %v1097_v43 = vld [vmem:[%s1930_s1 + $0x78] sm:$0xff] }
 0x27c   :  { %1075 = vrcp.f32 %v624_v54  ;;  %857 = vst.msk [vmem:[%s1931_s2 + $0x30] sm:$0xff] %vm75_vm0, %v757_v17  ;;  %844 = vmatmul.f32.gmra.mxu3 %v719_v5 }
 0x27d   :  { %873 = vst.msk [vmem:[%s1931_s2 + $0xb0] sm:$0xff] %vm75_vm0, %v822_v63  ;;  %779 = vmatmul.f32.gmra.mxu2 %v703_v26 }
 0x281   :  { %v759_v3 = vpop.f32.mrf.mxu2 }
 0x282   :  { %v1076_v24 = vpop.eup %1075  ;;  %v824_v49 = vpop.f32.mrf.mxu3  ;;  %v760_v20 = vadd.f32 %v1081_v29, %v759_v3 }
 0x283   :  { %v825_v48 = vadd.f32 %v1082_v30, %v824_v49  ;;  %v656_v45 = vpop.xlane.xlu0 %655  ;;  %v704_v19 = vmul.f32 %v1076_v24, %v1711_v21 }
 0x284   :  { %1077 = vrcp.f32 %v656_v45  ;;  %858 = vst.msk [vmem:[%s1931_s2 + $0x38] sm:$0xff] %vm75_vm0, %v760_v20 }
 0x285   :  { %874 = vst.msk [vmem:[%s1931_s2 + $0xb8] sm:$0xff] %vm75_vm0, %v825_v48  ;;  %782 = vmatmul.f32.gmra.mxu2 %v704_v19 }
 0x289   :  { %v762_v23 = vpop.f32.mrf.mxu2 }
 0x28a   :  { %v1078_v55 = vpop.eup %1077  ;;  %v827_v31 = vpop.f32.mrf.mxu3  ;;  %v763_v21 = vadd.f32 %v1083_v59, %v762_v23 }
 0x28b   :  { %v828_v58 = vadd.f32 %v1084_v50, %v827_v31  ;;  %v720_v18 = vmul.f32 %v1078_v55, %v1716_v28  ;;  %v1086_v28 = vld [vmem:[%s1930_s1 + $0xc8] sm:$0xff] }
 0x28c   :  { %859 = vst.msk [vmem:[%s1931_s2 + $0x40] sm:$0xff] %vm75_vm0, %v763_v21 }
 0x28d   :  { %847 = vmatmul.f32.gmra.mxu3 %v720_v18  ;;  %875 = vst.msk [vmem:[%s1931_s2 + $0xc0] sm:$0xff] %vm75_vm0, %v828_v58 }
 0x291   :  { %v765_v14 = vpop.f32.mrf.mxu2 }
 0x292   :  { %v830_v16 = vpop.f32.mrf.mxu3  ;;  %v766_v52 = vadd.f32 %v1085_v32, %v765_v14 }
 0x293   :  { %v831_v61 = vadd.f32 %v1086_v28, %v830_v16 }
 0x294   :  { %860 = vst.msk [vmem:[%s1931_s2 + $0x48] sm:$0xff] %vm75_vm0, %v766_v52 }
 0x295   :  { %876 = vst.msk [vmem:[%s1931_s2 + $0xc8] sm:$0xff] %vm75_vm0, %v831_v61 }
 0x299   :  { %v768_v8 = vpop.f32.mrf.mxu2 }
 0x29a   :  { %v833_v1 = vpop.f32.mrf.mxu3  ;;  %v769_v33 = vadd.f32 %v1087_v11, %v768_v8 }
 0x29b   :  { %v834_v10 = vadd.f32 %v1088_v34, %v833_v1 }
 0x29c   :  { %861 = vst.msk [vmem:[%s1931_s2 + $0x50] sm:$0xff] %vm75_vm0, %v769_v33 }
 0x29d   :  { %877 = vst.msk [vmem:[%s1931_s2 + $0xd0] sm:$0xff] %vm75_vm0, %v834_v10 }
 0x2a2   :  { %v836_v35 = vpop.f32.mrf.mxu3 }
 0x2a3   :  { %v837_v46 = vadd.f32 %v1089_v9, %v836_v35 }
 0x2a5   :  { %878 = vst.msk [vmem:[%s1931_s2 + $0xd8] sm:$0xff] %vm75_vm0, %v837_v46 }
 0x2c6   :  { %v771_v2 = vpop.f32.mrf.mxu2 }
 0x2c7   :  { %v772_v36 = vadd.f32 %v1090_v44, %v771_v2 }
 0x2c9   :  { %862 = vst.msk [vmem:[%s1931_s2 + $0x58] sm:$0xff] %vm75_vm0, %v772_v36 }
 0x2d7   :  { %v774_v7 = vpop.f32.mrf.mxu2 }
 0x2d8   :  { %v775_v53 = vadd.f32 %v1091_v37, %v774_v7 }
 0x2da   :  { %863 = vst.msk [vmem:[%s1931_s2 + $0x60] sm:$0xff] %vm75_vm0, %v775_v53 }
 0x2de   :  { %v839_v22 = vpop.f32.mrf.mxu3 }
 0x2df   :  { %v840_v4 = vadd.f32 %v1092_v0, %v839_v22 }
 0x2e1   :  { %879 = vst.msk [vmem:[%s1931_s2 + $0xe0] sm:$0xff] %vm75_vm0, %v840_v4 }
 0x2e8   :  { %v842_v13 = vpop.f32.mrf.mxu3 }
 0x2e9   :  { %v843_v39 = vadd.f32 %v1093_v38, %v842_v13 }
 0x2eb   :  { %880 = vst.msk [vmem:[%s1931_s2 + $0xe8] sm:$0xff] %vm75_vm0, %v843_v39 }
 0x2f7   :  { %v777_v25 = vpop.f32.mrf.mxu2 }
 0x2f8   :  { %v778_v6 = vadd.f32 %v1094_v12, %v777_v25 }
 0x2fa   :  { %864 = vst.msk [vmem:[%s1931_s2 + $0x68] sm:$0xff] %vm75_vm0, %v778_v6 }
 0x2ff   :  { %v845_v47 = vpop.f32.mrf.mxu3 }
 0x300   :  { %v780_v40 = vpop.f32.mrf.mxu2  ;;  %v846_v62 = vadd.f32 %v1095_v41, %v845_v47 }
 0x301   :  { %v781_v42 = vadd.f32 %v1096_v15, %v780_v40 }
 0x302   :  { %881 = vst.msk [vmem:[%s1931_s2 + $0xf0] sm:$0xff] %vm75_vm0, %v846_v62 }
 0x303   :  { %865 = vst.msk [vmem:[%s1931_s2 + $0x70] sm:$0xff] %vm75_vm0, %v781_v42 }
 0x308   :  { %v783_v57 = vpop.f32.mrf.mxu2 }
 0x309   :  { %v784_v56 = vadd.f32 %v1097_v43, %v783_v57 }
 0x30b   :  { %866 = vst.msk [vmem:[%s1931_s2 + $0x78] sm:$0xff] %vm75_vm0, %v784_v56 }
 0x310   :  { %v848_v51 = vpop.f32.mrf.mxu3 }
 0x311   :  { %v849_v17 = vadd.f32 %v848_v51, %v1467_v27 }
 0x313   :  { %882 = vst.msk [vmem:[%s1931_s2 + $0xf8] sm:$0xff] %vm75_vm0, %v849_v17 }

</bundles_post_ra>
